<compile_context>
chip_gen: v5e
topology: v5e:2x2
jax: 0.10.0
libtpu: 0.0.40
codegen_flags: <defaults>
</compile_context>

<pallas_src>
import functools

import numpy as np
import jax
import jax.numpy as jnp
from jax.experimental import pallas as pl
from jax.experimental.pallas import tpu as pltpu


# ----------------------------------------------------------------------------
# Module config (mirrors the PyTorch ConvolutionalEncoder constructor args)
# ----------------------------------------------------------------------------
CFG = dict(
    input_dim=4,
    # (dim, kernel, stride, padding) -- classic VQ-VAE downsampling stack
    conv_layers=[(8, 4, 2, 1), (8, 3, 1, 1), (16, 4, 2, 1)],
    do_act=[True, True, True],
    do_res=[False, True, False],   # middle layer exercises ResWrapper(conv + ReLU)
    residual_layers=2,
)


# ----------------------------------------------------------------------------
# The single fused encoder kernel (runs once per image; grid=(N,), "parallel")
# ----------------------------------------------------------------------------
def _encoder_kernel(x0_ref, m1e_ref, w0_ref, b0_ref, w1_ref, b1_ref,
                    w2_ref, b2_ref, s3_ref, wr1_ref, br1_ref,
                    wr2_ref, br2_ref, p2_ref, s2_ref,
                    o_ref,
                    c2_ref, c3_ref, cr_ref,
                    *, d0, d1, d2, k1, k2, W1p, L1, GL1, L3, W2p, L2,
                    act0, act1, act2, res1, num_res):
    f32 = jnp.float32
    m1e = m1e_ref[...]                                   # (1, E1) interior mask, extended G1 coords

    # ---- conv_1 (stride-2; im2col built in the wrapper) [+ ReLU], written straight onto the
    #      padded grid G1 (halo / guard columns re-zeroed by the mask -> correct "same" padding).
    x1e = jnp.dot(w0_ref[...], x0_ref[...], preferred_element_type=f32) + b0_ref[...]
    if act0:
        x1e = jnp.maximum(x1e, 0.0)
    x1e = x1e * m1e                                      # (d0, E1)

    # ---- resconv_2: x2 = x1 + ReLU(conv3x3_same(x1)); one fused-K matmul over G1.
    for dh in range(k1):
        for dw in range(k1):
            r0 = (dh * k1 + dw) * d0
            base = dh * W1p + dw                         # centered taps (leading guard = GL1)
            c2_ref[r0:r0 + d0, :] = x1e[:, base:base + L1]
    acc2 = jnp.dot(w1_ref[...], c2_ref[...], preferred_element_type=f32) + b1_ref[...]
    if act1:
        acc2 = jnp.maximum(acc2, 0.0)
    if res1:
        acc2 = acc2 + x1e[:, GL1:GL1 + L1]
    x2g = acc2 * m1e[:, GL1:GL1 + L1]                    # (d1, L1) on G1, halo zeroed for conv_3

    # ---- conv_3 (stride-2) [+ ReLU]: fused-K matmul over the top-left-corner domain,
    #      then a single constant 0/1 selection matmul does the stride-2 crop (no tiny stores).
    for dh in range(k2):
        for dw in range(k2):
            r0 = (dh * k2 + dw) * d1
            base = dh * W1p + dw
            c3_ref[r0:r0 + d1, :] = x2g[:, base:base + L3]
    acc3 = jnp.dot(w2_ref[...], c3_ref[...], preferred_element_type=f32) + b2_ref[...]
    if act2:
        acc3 = jnp.maximum(acc3, 0.0)
    z = jnp.dot(acc3, s3_ref[...], preferred_element_type=f32)     # (d2, H2*W2)

    # ---- res_group: v = z; num_res x shared Residual; out = z + ReLU(v)
    # TODO(synk): Residual internals not in the prompt; assumes
    #   Residual(v) = v + conv1x1(relu(conv3x3_same(relu(v)))) with ONE shared module reused.
    v = z
    for _ in range(num_res):
        # pad relu(v) onto the residual grid G2 via a constant scatter matmul (zeros the halo too)
        ve = jnp.dot(jnp.maximum(v, 0.0), p2_ref[...], preferred_element_type=f32)   # (d2, E2)
        for dh in range(3):
            for dw in range(3):
                r0 = (dh * 3 + dw) * d2
                base = dh * W2p + dw
                cr_ref[r0:r0 + d2, :] = ve[:, base:base + L2]
        accr = jnp.dot(wr1_ref[...], cr_ref[...], preferred_element_type=f32) + br1_ref[...]
        h = jnp.dot(jnp.maximum(accr, 0.0), s2_ref[...], preferred_element_type=f32)  # interior crop
        v = v + jnp.dot(wr2_ref[...], h, preferred_element_type=f32) + br2_ref[...]
    o_ref[...] = z + jnp.maximum(v, 0.0)


# ----------------------------------------------------------------------------
# Host-side glue
# ----------------------------------------------------------------------------
def encoder_forward(x_nchw, params):
    N, Cin, H0, W0 = x_nchw.shape
    assert Cin == CFG["input_dim"] and len(CFG["conv_layers"]) == 3
    (d0, k0, s0, p0), (d1, k1, s1, p1), (d2, k2, s2, p2) = [tuple(c) for c in CFG["conv_layers"]]
    act, res = CFG["do_act"], CFG["do_res"]
    assert (not res[0]) and (not res[2]), "only the middle layer is wired as ResWrapper"
    assert s1 == 1 and 2 * p1 == k1 - 1, "middle conv must be a stride-1 'same' conv"
    assert p2 == p1, "fused padded layout assumes layer-2/layer-3 share the same halo width"
    if res[1]:
        assert d1 == d0, "ResWrapper conv must preserve the channel dim"
    num_res = CFG["residual_layers"]
    f32 = jnp.float32

    # spatial dims per stage
    H1 = (H0 + 2 * p0 - k0) // s0 + 1
    W1 = (W0 + 2 * p0 - k0) // s0 + 1
    H2 = (H1 + 2 * p2 - k2) // s2 + 1
    W2 = (W1 + 2 * p2 - k2) // s2 + 1

    # G1: padded grid (halo p1) that holds the layer-1/layer-2 activations, flat with pitch W1p.
    H1p, W1p = H1 + 2 * p1, W1 + 2 * p1
    L1 = H1p * W1p
    GL1 = p1 * W1p + p1                       # leading guard for centered k1 x k1 taps
    GT1 = (k1 - 1 - p1) * W1p + (k1 - 1 - p1)
    E1 = GL1 + L1 + GT1
    K0, K1, K2 = k0 * k0 * Cin, k1 * k1 * d0, k2 * k2 * d1
    # conv_3 evaluated (top-left convention) only over the columns that can be selected
    L3 = s2 * (H2 - 1) * W1p + s2 * (W2 - 1) + 1
    assert L3 - 1 + (k2 - 1) * W1p + (k2 - 1) <= L1 - 1

    # G2: padded grid for the residual 3x3 "same" convs on the (H2, W2) map.
    H2p, W2p = H2 + 2, W2 + 2
    L2 = H2p * W2p
    GL2 = W2p + 1
    E2 = GL2 + L2 + GL2
    Kr = 9 * d2
    M2 = H2 * W2

    # ---- wrapper-side im2col for conv_1 only; columns are indexed by the EXTENDED G1 grid so
    #      the kernel's conv_1 matmul lands directly in the padded layout (halo columns = 0).
    xp = jnp.pad(x_nchw.astype(f32), ((0, 0), (0, 0), (p0, p0), (p0, p0)))
    taps = []
    for dh in range(k0):
        for dw in range(k0):
            taps.append(xp[:, :, dh:dh + s0 * (H1 - 1) + 1:s0, dw:dw + s0 * (W1 - 1) + 1:s0])
    x0 = jnp.stack(taps, axis=1).reshape(N, K0, H1, W1)          # rows ordered (dh, dw, ci)
    x0 = jnp.pad(x0, ((0, 0), (0, 0), (p1, p1), (p1, p1))).reshape(N, K0, L1)
    x0 = jnp.pad(x0, ((0, 0), (0, 0), (GL1, GT1)))               # (N, K0, E1)

    # ---- constant masks / selection matrices (trace-time numpy, tiny)
    m1e = np.zeros((1, E1), np.float32)
    for hp in range(p1, p1 + H1):
        for wp in range(p1, p1 + W1):
            m1e[0, GL1 + hp * W1p + wp] = 1.0
    s3 = np.zeros((L3, M2), np.float32)     # stride-2 output selection for conv_3
    p2m = np.zeros((M2, E2), np.float32)    # pad-scatter onto G2 for the residual 3x3 convs
    s2m = np.zeros((L2, M2), np.float32)    # interior crop from G2
    for ho in range(H2):
        for wo in range(W2):
            j = ho * W2 + wo
            s3[s2 * ho * W1p + s2 * wo, j] = 1.0
            p2m[j, GL2 + (ho + 1) * W2p + (wo + 1)] = 1.0
            s2m[(ho + 1) * W2p + (wo + 1), j] = 1.0

    # ---- weights as lane-dense (Cout, K) matmul operands (HWIO -> (K, Cout) -> transpose)
    c0p, c1p, c2p = params["convs"]
    rp = params["res"]
    args = (
        x0, jnp.asarray(m1e),
        c0p["w"].reshape(K0, d0).T, c0p["b"].reshape(d0, 1),
        c1p["w"].reshape(K1, d1).T, c1p["b"].reshape(d1, 1),
        c2p["w"].reshape(K2, d2).T, c2p["b"].reshape(d2, 1),
        jnp.asarray(s3),
        rp["w1"].reshape(Kr, d2).T, rp["b1"].reshape(d2, 1),
        rp["w2"].reshape(d2, d2).T, rp["b2"].reshape(d2, 1),
        jnp.asarray(p2m), jnp.asarray(s2m),
    )

    in_specs = [pl.BlockSpec((None, K0, E1), lambda n: (n, 0, 0))] + [
        pl.BlockSpec(a.shape, lambda n: (0, 0)) for a in args[1:]
    ]

    kernel = functools.partial(
        _encoder_kernel,
        d0=d0, d1=d1, d2=d2, k1=k1, k2=k2, W1p=W1p, L1=L1, GL1=GL1, L3=L3,
        W2p=W2p, L2=L2, act0=act[0], act1=act[1], act2=act[2], res1=res[1],
        num_res=num_res)

    out = pl.pallas_call(
        kernel,
        out_shape=jax.ShapeDtypeStruct((N, d2, M2), f32),
        grid=(N,),
        in_specs=in_specs,
        out_specs=pl.BlockSpec((None, d2, M2), lambda n: (n, 0, 0)),
        scratch_shapes=[
            pltpu.VMEM((K1, L1), f32),   # conv_2 im2col  (72, 100)
            pltpu.VMEM((K2, L3), f32),   # conv_3 im2col  (128, 67)
            pltpu.VMEM((Kr, L2), f32),   # residual im2col (144, 36)
        ],
        compiler_params=pltpu.CompilerParams(
            dimension_semantics=("parallel",)),   # both TCs on v7x (one image per core)
    )(*args)

    # (C, ho*W2+wo) per image is already NCHW order
    return out.reshape(N, d2, H2, W2)


# ----------------------------------------------------------------------------
# Pure-JAX reference (XLA convs) for self-validation, and param init
# ----------------------------------------------------------------------------
def _conv_ref(x, w, b, stride, padding):
    y = jax.lax.conv_general_dilated(
        x, w, window_strides=(stride, stride),
        padding=[(padding, padding), (padding, padding)],
        dimension_numbers=("NHWC", "HWIO", "NHWC"),
        precision=jax.lax.Precision.HIGHEST)
    return y + b


def encoder_forward_ref(x_nchw, params):
    (d0, k0, s0, p0), (d1, k1, s1, p1), (d2, k2, s2, p2) = CFG["conv_layers"]
    act, res = CFG["do_act"], CFG["do_res"]
    c0, c1, c2 = params["convs"]
    r = params["res"]
    x = jnp.transpose(x_nchw, (0, 2, 3, 1))
    x = _conv_ref(x, c0["w"], c0["b"], s0, p0)
    if act[0]:
        x = jax.nn.relu(x)
    h = _conv_ref(x, c1["w"], c1["b"], s1, p1)
    if act[1]:
        h = jax.nn.relu(h)
    x = x + h if res[1] else h
    x = _conv_ref(x, c2["w"], c2["b"], s2, p2)
    if act[2]:
        x = jax.nn.relu(x)
    v = x
    for _ in range(CFG["residual_layers"]):   # shared Residual weights, applied L times
        t = jax.nn.relu(_conv_ref(jax.nn.relu(v), r["w1"], r["b1"], 1, 1))
        v = v + _conv_ref(t, r["w2"], r["b2"], 1, 0)
    x = x + jax.nn.relu(v)
    return jnp.transpose(x, (0, 3, 1, 2))


def init_params(key):
    # Deterministic synthetic init (kaiming-style scaling; weight_norm folds to identity).
    params = {"convs": []}
    in_d = CFG["input_dim"]
    for (dim, k, _s, _p) in CFG["conv_layers"]:
        key, kw_ = jax.random.split(key)
        fan_in = in_d * k * k
        w = jax.random.normal(kw_, (k, k, in_d, dim), jnp.float32) * jnp.sqrt(2.0 / fan_in)
        b = jnp.zeros((dim,), jnp.float32)
        params["convs"].append({"w": w, "b": b})
        in_d = dim
    d = in_d
    key, k1, k2 = jax.random.split(key, 3)
    params["res"] = {
        "w1": jax.random.normal(k1, (3, 3, d, d), jnp.float32) * jnp.sqrt(2.0 / (9 * d)),
        "b1": jnp.zeros((d,), jnp.float32),
        "w2": jax.random.normal(k2, (1, 1, d, d), jnp.float32) * jnp.sqrt(2.0 / d),
        "b2": jnp.zeros((d,), jnp.float32),
    }
    return params


if __name__ == "__main__":
    key = jax.random.PRNGKey(0)
    key, xkey = jax.random.split(key)
    x = jax.random.normal(xkey, (2, 4, 16, 16), jnp.float32)  # NCHW, like the PyTorch module
    params = init_params(key)

    fwd = jax.jit(encoder_forward)
    out = jax.block_until_ready(fwd(x, params))

    # Expected output: (2, 16, 4, 4) NCHW after two stride-2 downsamplings to 16 channels.
    assert out.shape == (2, 16, 4, 4), out.shape
    assert out.dtype == jnp.float32
    assert bool(jnp.all(jnp.isfinite(out)))

    # Numeric self-check against a plain-JAX (XLA conv) reference of the same module.
    # Tolerance tightened 2x vs. the previous version; the remaining slack covers the MXU's
    # default f32 (multi-pass bf16) matmul path vs. the Precision.HIGHEST XLA reference.
    ref = jax.block_until_ready(jax.jit(encoder_forward_ref)(x, params))
    assert bool(jnp.allclose(out, ref, atol=1e-2, rtol=1e-2)), float(
        jnp.max(jnp.abs(out - ref)))

    print("KERNEL_OK")
</pallas_src>

<mosaic_0001>
module attributes {stable_mosaic.version = 11 : i64} {
  func.func @_encoder_kernel(%arg0: i32, %arg1: memref<1x64x122xf32, #tpu.memory_space<vmem>>, %arg2: memref<1x122xf32, #tpu.memory_space<vmem>>, %arg3: memref<8x64xf32, #tpu.memory_space<vmem>>, %arg4: memref<8x1xf32, #tpu.memory_space<vmem>>, %arg5: memref<8x72xf32, #tpu.memory_space<vmem>>, %arg6: memref<8x1xf32, #tpu.memory_space<vmem>>, %arg7: memref<16x128xf32, #tpu.memory_space<vmem>>, %arg8: memref<16x1xf32, #tpu.memory_space<vmem>>, %arg9: memref<67x16xf32, #tpu.memory_space<vmem>>, %arg10: memref<16x144xf32, #tpu.memory_space<vmem>>, %arg11: memref<16x1xf32, #tpu.memory_space<vmem>>, %arg12: memref<16x16xf32, #tpu.memory_space<vmem>>, %arg13: memref<16x1xf32, #tpu.memory_space<vmem>>, %arg14: memref<16x50xf32, #tpu.memory_space<vmem>>, %arg15: memref<36x16xf32, #tpu.memory_space<vmem>>, %arg16: memref<1x16x16xf32, #tpu.memory_space<vmem>>, %arg17: memref<72x100xf32, #tpu.memory_space<vmem>>, %arg18: memref<128x67xf32, #tpu.memory_space<vmem>>, %arg19: memref<144x36xf32, #tpu.memory_space<vmem>>) attributes {dimension_semantics = [#tpu.dimension_semantics<parallel>], iteration_bounds = array<i64: 2>, scalar_prefetch = 0 : i64, scratch_operands = 3 : i64, tpu.core_type = #tpu.core_type<tc>, window_params = [{transform_indices = @transform_0, window_bounds = array<i64: 1, 64, 122>}, {pipeline_mode = #tpu.pipeline_mode<synchronous>, transform_indices = @transform_1, window_bounds = array<i64: 1, 122>}, {pipeline_mode = #tpu.pipeline_mode<synchronous>, transform_indices = @transform_2, window_bounds = array<i64: 8, 64>}, {pipeline_mode = #tpu.pipeline_mode<synchronous>, transform_indices = @transform_3, window_bounds = array<i64: 8, 1>}, {pipeline_mode = #tpu.pipeline_mode<synchronous>, transform_indices = @transform_4, window_bounds = array<i64: 8, 72>}, {pipeline_mode = #tpu.pipeline_mode<synchronous>, transform_indices = @transform_5, window_bounds = array<i64: 8, 1>}, {pipeline_mode = #tpu.pipeline_mode<synchronous>, transform_indices = @transform_6, window_bounds = array<i64: 16, 128>}, {pipeline_mode = #tpu.pipeline_mode<synchronous>, transform_indices = @transform_7, window_bounds = array<i64: 16, 1>}, {pipeline_mode = #tpu.pipeline_mode<synchronous>, transform_indices = @transform_8, window_bounds = array<i64: 67, 16>}, {pipeline_mode = #tpu.pipeline_mode<synchronous>, transform_indices = @transform_9, window_bounds = array<i64: 16, 144>}, {pipeline_mode = #tpu.pipeline_mode<synchronous>, transform_indices = @transform_10, window_bounds = array<i64: 16, 1>}, {pipeline_mode = #tpu.pipeline_mode<synchronous>, transform_indices = @transform_11, window_bounds = array<i64: 16, 16>}, {pipeline_mode = #tpu.pipeline_mode<synchronous>, transform_indices = @transform_12, window_bounds = array<i64: 16, 1>}, {pipeline_mode = #tpu.pipeline_mode<synchronous>, transform_indices = @transform_13, window_bounds = array<i64: 16, 50>}, {pipeline_mode = #tpu.pipeline_mode<synchronous>, transform_indices = @transform_14, window_bounds = array<i64: 36, 16>}, {transform_indices = @transform_15, window_bounds = array<i64: 1, 16, 16>}]} {
    %c0 = arith.constant 0 : index
    %c0_0 = arith.constant 0 : index
    %0 = vector.load %arg2[%c0, %c0_0] : memref<1x122xf32, #tpu.memory_space<vmem>>, vector<1x122xf32>
    %c0_1 = arith.constant 0 : index
    %c0_2 = arith.constant 0 : index
    %1 = vector.load %arg3[%c0_1, %c0_2] : memref<8x64xf32, #tpu.memory_space<vmem>>, vector<8x64xf32>
    %c0_3 = arith.constant 0 : index
    %c0_4 = arith.constant 0 : index
    %c0_5 = arith.constant 0 : index
    %2 = vector.load %arg1[%c0_3, %c0_4, %c0_5] : memref<1x64x122xf32, #tpu.memory_space<vmem>>, vector<1x64x122xf32>
    %3 = vector.shape_cast %2 : vector<1x64x122xf32> to vector<64x122xf32>
    %cst = arith.constant dense<0.000000e+00> : vector<8x122xf32>
    %4 = tpu.matmul %1, %3, %cst {dimension_numbers = #tpu.dot_dimension_numbers<[1], [0], [0], [1], [0, 0, 1, 1], [], []>} : vector<8x64xf32>, vector<64x122xf32>, vector<8x122xf32> -> vector<8x122xf32>
    %c0_6 = arith.constant 0 : index
    %c0_7 = arith.constant 0 : index
    %5 = vector.load %arg4[%c0_6, %c0_7] : memref<8x1xf32, #tpu.memory_space<vmem>>, vector<8x1xf32>
    %6 = vector.broadcast %5 : vector<8x1xf32> to vector<8x122xf32>
    %7 = arith.addf %4, %6 : vector<8x122xf32>
    %cst_8 = arith.constant 0.000000e+00 : f32
    %8 = vector.broadcast %cst_8 : f32 to vector<8x122xf32>
    %9 = arith.maximumf %7, %8 : vector<8x122xf32>
    %10 = vector.broadcast %0 : vector<1x122xf32> to vector<8x122xf32>
    %11 = arith.mulf %9, %10 : vector<8x122xf32>
    %12 = vector.extract_strided_slice %11 {offsets = [0, 0], sizes = [8, 100], strides = [1, 1]} : vector<8x122xf32> to vector<8x100xf32>
    %c0_9 = arith.constant 0 : index
    %c0_10 = arith.constant 0 : index
    %13 = vector.load %arg17[%c0_9, %c0_10] : memref<72x100xf32, #tpu.memory_space<vmem>>, vector<8x100xf32>
    tpu.vector_store %arg17[%c0_9, %c0_10], %12 {strides = array<i32>} : memref<72x100xf32, #tpu.memory_space<vmem>>, vector<8x100xf32>,
    %14 = vector.extract_strided_slice %11 {offsets = [0, 1], sizes = [8, 100], strides = [1, 1]} : vector<8x122xf32> to vector<8x100xf32>
    %c8 = arith.constant 8 : index
    %c0_11 = arith.constant 0 : index
    %15 = vector.load %arg17[%c8, %c0_11] : memref<72x100xf32, #tpu.memory_space<vmem>>, vector<8x100xf32>
    tpu.vector_store %arg17[%c8, %c0_11], %14 {strides = array<i32>} : memref<72x100xf32, #tpu.memory_space<vmem>>, vector<8x100xf32>,
    %16 = vector.extract_strided_slice %11 {offsets = [0, 2], sizes = [8, 100], strides = [1, 1]} : vector<8x122xf32> to vector<8x100xf32>
    %c16 = arith.constant 16 : index
    %c0_12 = arith.constant 0 : index
    %17 = vector.load %arg17[%c16, %c0_12] : memref<72x100xf32, #tpu.memory_space<vmem>>, vector<8x100xf32>
    tpu.vector_store %arg17[%c16, %c0_12], %16 {strides = array<i32>} : memref<72x100xf32, #tpu.memory_space<vmem>>, vector<8x100xf32>,
    %18 = vector.extract_strided_slice %11 {offsets = [0, 10], sizes = [8, 100], strides = [1, 1]} : vector<8x122xf32> to vector<8x100xf32>
    %c24 = arith.constant 24 : index
    %c0_13 = arith.constant 0 : index
    %19 = vector.load %arg17[%c24, %c0_13] : memref<72x100xf32, #tpu.memory_space<vmem>>, vector<8x100xf32>
    tpu.vector_store %arg17[%c24, %c0_13], %18 {strides = array<i32>} : memref<72x100xf32, #tpu.memory_space<vmem>>, vector<8x100xf32>,
    %20 = vector.extract_strided_slice %11 {offsets = [0, 11], sizes = [8, 100], strides = [1, 1]} : vector<8x122xf32> to vector<8x100xf32>
    %c32 = arith.constant 32 : index
    %c0_14 = arith.constant 0 : index
    %21 = vector.load %arg17[%c32, %c0_14] : memref<72x100xf32, #tpu.memory_space<vmem>>, vector<8x100xf32>
    tpu.vector_store %arg17[%c32, %c0_14], %20 {strides = array<i32>} : memref<72x100xf32, #tpu.memory_space<vmem>>, vector<8x100xf32>,
    %22 = vector.extract_strided_slice %11 {offsets = [0, 12], sizes = [8, 100], strides = [1, 1]} : vector<8x122xf32> to vector<8x100xf32>
    %c40 = arith.constant 40 : index
    %c0_15 = arith.constant 0 : index
    %23 = vector.load %arg17[%c40, %c0_15] : memref<72x100xf32, #tpu.memory_space<vmem>>, vector<8x100xf32>
    tpu.vector_store %arg17[%c40, %c0_15], %22 {strides = array<i32>} : memref<72x100xf32, #tpu.memory_space<vmem>>, vector<8x100xf32>,
    %24 = vector.extract_strided_slice %11 {offsets = [0, 20], sizes = [8, 100], strides = [1, 1]} : vector<8x122xf32> to vector<8x100xf32>
    %c48 = arith.constant 48 : index
    %c0_16 = arith.constant 0 : index
    %25 = vector.load %arg17[%c48, %c0_16] : memref<72x100xf32, #tpu.memory_space<vmem>>, vector<8x100xf32>
    tpu.vector_store %arg17[%c48, %c0_16], %24 {strides = array<i32>} : memref<72x100xf32, #tpu.memory_space<vmem>>, vector<8x100xf32>,
    %26 = vector.extract_strided_slice %11 {offsets = [0, 21], sizes = [8, 100], strides = [1, 1]} : vector<8x122xf32> to vector<8x100xf32>
    %c56 = arith.constant 56 : index
    %c0_17 = arith.constant 0 : index
    %27 = vector.load %arg17[%c56, %c0_17] : memref<72x100xf32, #tpu.memory_space<vmem>>, vector<8x100xf32>
    tpu.vector_store %arg17[%c56, %c0_17], %26 {strides = array<i32>} : memref<72x100xf32, #tpu.memory_space<vmem>>, vector<8x100xf32>,
    %28 = vector.extract_strided_slice %11 {offsets = [0, 22], sizes = [8, 100], strides = [1, 1]} : vector<8x122xf32> to vector<8x100xf32>
    %c64 = arith.constant 64 : index
    %c0_18 = arith.constant 0 : index
    %29 = vector.load %arg17[%c64, %c0_18] : memref<72x100xf32, #tpu.memory_space<vmem>>, vector<8x100xf32>
    tpu.vector_store %arg17[%c64, %c0_18], %28 {strides = array<i32>} : memref<72x100xf32, #tpu.memory_space<vmem>>, vector<8x100xf32>,
    %c0_19 = arith.constant 0 : index
    %c0_20 = arith.constant 0 : index
    %30 = vector.load %arg5[%c0_19, %c0_20] : memref<8x72xf32, #tpu.memory_space<vmem>>, vector<8x72xf32>
    %c0_21 = arith.constant 0 : index
    %c0_22 = arith.constant 0 : index
    %31 = vector.load %arg17[%c0_21, %c0_22] : memref<72x100xf32, #tpu.memory_space<vmem>>, vector<72x100xf32>
    %cst_23 = arith.constant dense<0.000000e+00> : vector<8x100xf32>
    %32 = tpu.matmul %30, %31, %cst_23 {dimension_numbers = #tpu.dot_dimension_numbers<[1], [0], [0], [1], [0, 0, 1, 1], [], []>} : vector<8x72xf32>, vector<72x100xf32>, vector<8x100xf32> -> vector<8x100xf32>
    %c0_24 = arith.constant 0 : index
    %c0_25 = arith.constant 0 : index
    %33 = vector.load %arg6[%c0_24, %c0_25] : memref<8x1xf32, #tpu.memory_space<vmem>>, vector<8x1xf32>
    %34 = vector.broadcast %33 : vector<8x1xf32> to vector<8x100xf32>
    %35 = arith.addf %32, %34 : vector<8x100xf32>
    %cst_26 = arith.constant 0.000000e+00 : f32
    %36 = vector.broadcast %cst_26 : f32 to vector<8x100xf32>
    %37 = arith.maximumf %35, %36 : vector<8x100xf32>
    %38 = vector.extract_strided_slice %11 {offsets = [0, 11], sizes = [8, 100], strides = [1, 1]} : vector<8x122xf32> to vector<8x100xf32>
    %39 = arith.addf %37, %38 : vector<8x100xf32>
    %40 = vector.extract_strided_slice %0 {offsets = [0, 11], sizes = [1, 100], strides = [1, 1]} : vector<1x122xf32> to vector<1x100xf32>
    %41 = vector.broadcast %40 : vector<1x100xf32> to vector<8x100xf32>
    %42 = arith.mulf %39, %41 : vector<8x100xf32>
    %43 = vector.extract_strided_slice %42 {offsets = [0, 0], sizes = [8, 67], strides = [1, 1]} : vector<8x100xf32> to vector<8x67xf32>
    %c0_27 = arith.constant 0 : index
    %c0_28 = arith.constant 0 : index
    %44 = vector.load %arg18[%c0_27, %c0_28] : memref<128x67xf32, #tpu.memory_space<vmem>>, vector<8x67xf32>
    tpu.vector_store %arg18[%c0_27, %c0_28], %43 {strides = array<i32>} : memref<128x67xf32, #tpu.memory_space<vmem>>, vector<8x67xf32>,
    %45 = vector.extract_strided_slice %42 {offsets = [0, 1], sizes = [8, 67], strides = [1, 1]} : vector<8x100xf32> to vector<8x67xf32>
    %c8_29 = arith.constant 8 : index
    %c0_30 = arith.constant 0 : index
    %46 = vector.load %arg18[%c8_29, %c0_30] : memref<128x67xf32, #tpu.memory_space<vmem>>, vector<8x67xf32>
    tpu.vector_store %arg18[%c8_29, %c0_30], %45 {strides = array<i32>} : memref<128x67xf32, #tpu.memory_space<vmem>>, vector<8x67xf32>,
    %47 = vector.extract_strided_slice %42 {offsets = [0, 2], sizes = [8, 67], strides = [1, 1]} : vector<8x100xf32> to vector<8x67xf32>
    %c16_31 = arith.constant 16 : index
    %c0_32 = arith.constant 0 : index
    %48 = vector.load %arg18[%c16_31, %c0_32] : memref<128x67xf32, #tpu.memory_space<vmem>>, vector<8x67xf32>
    tpu.vector_store %arg18[%c16_31, %c0_32], %47 {strides = array<i32>} : memref<128x67xf32, #tpu.memory_space<vmem>>, vector<8x67xf32>,
    %49 = vector.extract_strided_slice %42 {offsets = [0, 3], sizes = [8, 67], strides = [1, 1]} : vector<8x100xf32> to vector<8x67xf32>
    %c24_33 = arith.constant 24 : index
    %c0_34 = arith.constant 0 : index
    %50 = vector.load %arg18[%c24_33, %c0_34] : memref<128x67xf32, #tpu.memory_space<vmem>>, vector<8x67xf32>
    tpu.vector_store %arg18[%c24_33, %c0_34], %49 {strides = array<i32>} : memref<128x67xf32, #tpu.memory_space<vmem>>, vector<8x67xf32>,
    %51 = vector.extract_strided_slice %42 {offsets = [0, 10], sizes = [8, 67], strides = [1, 1]} : vector<8x100xf32> to vector<8x67xf32>
    %c32_35 = arith.constant 32 : index
    %c0_36 = arith.constant 0 : index
    %52 = vector.load %arg18[%c32_35, %c0_36] : memref<128x67xf32, #tpu.memory_space<vmem>>, vector<8x67xf32>
    tpu.vector_store %arg18[%c32_35, %c0_36], %51 {strides = array<i32>} : memref<128x67xf32, #tpu.memory_space<vmem>>, vector<8x67xf32>,
    %53 = vector.extract_strided_slice %42 {offsets = [0, 11], sizes = [8, 67], strides = [1, 1]} : vector<8x100xf32> to vector<8x67xf32>
    %c40_37 = arith.constant 40 : index
    %c0_38 = arith.constant 0 : index
    %54 = vector.load %arg18[%c40_37, %c0_38] : memref<128x67xf32, #tpu.memory_space<vmem>>, vector<8x67xf32>
    tpu.vector_store %arg18[%c40_37, %c0_38], %53 {strides = array<i32>} : memref<128x67xf32, #tpu.memory_space<vmem>>, vector<8x67xf32>,
    %55 = vector.extract_strided_slice %42 {offsets = [0, 12], sizes = [8, 67], strides = [1, 1]} : vector<8x100xf32> to vector<8x67xf32>
    %c48_39 = arith.constant 48 : index
    %c0_40 = arith.constant 0 : index
    %56 = vector.load %arg18[%c48_39, %c0_40] : memref<128x67xf32, #tpu.memory_space<vmem>>, vector<8x67xf32>
    tpu.vector_store %arg18[%c48_39, %c0_40], %55 {strides = array<i32>} : memref<128x67xf32, #tpu.memory_space<vmem>>, vector<8x67xf32>,
    %57 = vector.extract_strided_slice %42 {offsets = [0, 13], sizes = [8, 67], strides = [1, 1]} : vector<8x100xf32> to vector<8x67xf32>
    %c56_41 = arith.constant 56 : index
    %c0_42 = arith.constant 0 : index
    %58 = vector.load %arg18[%c56_41, %c0_42] : memref<128x67xf32, #tpu.memory_space<vmem>>, vector<8x67xf32>
    tpu.vector_store %arg18[%c56_41, %c0_42], %57 {strides = array<i32>} : memref<128x67xf32, #tpu.memory_space<vmem>>, vector<8x67xf32>,
    %59 = vector.extract_strided_slice %42 {offsets = [0, 20], sizes = [8, 67], strides = [1, 1]} : vector<8x100xf32> to vector<8x67xf32>
    %c64_43 = arith.constant 64 : index
    %c0_44 = arith.constant 0 : index
    %60 = vector.load %arg18[%c64_43, %c0_44] : memref<128x67xf32, #tpu.memory_space<vmem>>, vector<8x67xf32>
    tpu.vector_store %arg18[%c64_43, %c0_44], %59 {strides = array<i32>} : memref<128x67xf32, #tpu.memory_space<vmem>>, vector<8x67xf32>,
    %61 = vector.extract_strided_slice %42 {offsets = [0, 21], sizes = [8, 67], strides = [1, 1]} : vector<8x100xf32> to vector<8x67xf32>
    %c72 = arith.constant 72 : index
    %c0_45 = arith.constant 0 : index
    %62 = vector.load %arg18[%c72, %c0_45] : memref<128x67xf32, #tpu.memory_space<vmem>>, vector<8x67xf32>
    tpu.vector_store %arg18[%c72, %c0_45], %61 {strides = array<i32>} : memref<128x67xf32, #tpu.memory_space<vmem>>, vector<8x67xf32>,
    %63 = vector.extract_strided_slice %42 {offsets = [0, 22], sizes = [8, 67], strides = [1, 1]} : vector<8x100xf32> to vector<8x67xf32>
    %c80 = arith.constant 80 : index
    %c0_46 = arith.constant 0 : index
    %64 = vector.load %arg18[%c80, %c0_46] : memref<128x67xf32, #tpu.memory_space<vmem>>, vector<8x67xf32>
    tpu.vector_store %arg18[%c80, %c0_46], %63 {strides = array<i32>} : memref<128x67xf32, #tpu.memory_space<vmem>>, vector<8x67xf32>,
    %65 = vector.extract_strided_slice %42 {offsets = [0, 23], sizes = [8, 67], strides = [1, 1]} : vector<8x100xf32> to vector<8x67xf32>
    %c88 = arith.constant 88 : index
    %c0_47 = arith.constant 0 : index
    %66 = vector.load %arg18[%c88, %c0_47] : memref<128x67xf32, #tpu.memory_space<vmem>>, vector<8x67xf32>
    tpu.vector_store %arg18[%c88, %c0_47], %65 {strides = array<i32>} : memref<128x67xf32, #tpu.memory_space<vmem>>, vector<8x67xf32>,
    %67 = vector.extract_strided_slice %42 {offsets = [0, 30], sizes = [8, 67], strides = [1, 1]} : vector<8x100xf32> to vector<8x67xf32>
    %c96 = arith.constant 96 : index
    %c0_48 = arith.constant 0 : index
    %68 = vector.load %arg18[%c96, %c0_48] : memref<128x67xf32, #tpu.memory_space<vmem>>, vector<8x67xf32>
    tpu.vector_store %arg18[%c96, %c0_48], %67 {strides = array<i32>} : memref<128x67xf32, #tpu.memory_space<vmem>>, vector<8x67xf32>,
    %69 = vector.extract_strided_slice %42 {offsets = [0, 31], sizes = [8, 67], strides = [1, 1]} : vector<8x100xf32> to vector<8x67xf32>
    %c104 = arith.constant 104 : index
    %c0_49 = arith.constant 0 : index
    %70 = vector.load %arg18[%c104, %c0_49] : memref<128x67xf32, #tpu.memory_space<vmem>>, vector<8x67xf32>
    tpu.vector_store %arg18[%c104, %c0_49], %69 {strides = array<i32>} : memref<128x67xf32, #tpu.memory_space<vmem>>, vector<8x67xf32>,
    %71 = vector.extract_strided_slice %42 {offsets = [0, 32], sizes = [8, 67], strides = [1, 1]} : vector<8x100xf32> to vector<8x67xf32>
    %c112 = arith.constant 112 : index
    %c0_50 = arith.constant 0 : index
    %72 = vector.load %arg18[%c112, %c0_50] : memref<128x67xf32, #tpu.memory_space<vmem>>, vector<8x67xf32>
    tpu.vector_store %arg18[%c112, %c0_50], %71 {strides = array<i32>} : memref<128x67xf32, #tpu.memory_space<vmem>>, vector<8x67xf32>,
    %73 = vector.extract_strided_slice %42 {offsets = [0, 33], sizes = [8, 67], strides = [1, 1]} : vector<8x100xf32> to vector<8x67xf32>
    %c120 = arith.constant 120 : index
    %c0_51 = arith.constant 0 : index
    %74 = vector.load %arg18[%c120, %c0_51] : memref<128x67xf32, #tpu.memory_space<vmem>>, vector<8x67xf32>
    tpu.vector_store %arg18[%c120, %c0_51], %73 {strides = array<i32>} : memref<128x67xf32, #tpu.memory_space<vmem>>, vector<8x67xf32>,
    %c0_52 = arith.constant 0 : index
    %c0_53 = arith.constant 0 : index
    %75 = vector.load %arg7[%c0_52, %c0_53] : memref<16x128xf32, #tpu.memory_space<vmem>>, vector<16x128xf32>
    %c0_54 = arith.constant 0 : index
    %c0_55 = arith.constant 0 : index
    %76 = vector.load %arg18[%c0_54, %c0_55] : memref<128x67xf32, #tpu.memory_space<vmem>>, vector<128x67xf32>
    %cst_56 = arith.constant dense<0.000000e+00> : vector<16x67xf32>
    %77 = tpu.matmul %75, %76, %cst_56 {dimension_numbers = #tpu.dot_dimension_numbers<[1], [0], [0], [1], [0, 0, 1, 1], [], []>} : vector<16x128xf32>, vector<128x67xf32>, vector<16x67xf32> -> vector<16x67xf32>
    %c0_57 = arith.constant 0 : index
    %c0_58 = arith.constant 0 : index
    %78 = vector.load %arg8[%c0_57, %c0_58] : memref<16x1xf32, #tpu.memory_space<vmem>>, vector<16x1xf32>
    %79 = vector.broadcast %78 : vector<16x1xf32> to vector<16x67xf32>
    %80 = arith.addf %77, %79 : vector<16x67xf32>
    %cst_59 = arith.constant 0.000000e+00 : f32
    %81 = vector.broadcast %cst_59 : f32 to vector<16x67xf32>
    %82 = arith.maximumf %80, %81 : vector<16x67xf32>
    %c0_60 = arith.constant 0 : index
    %c0_61 = arith.constant 0 : index
    %83 = vector.load %arg9[%c0_60, %c0_61] : memref<67x16xf32, #tpu.memory_space<vmem>>, vector<67x16xf32>
    %cst_62 = arith.constant dense<0.000000e+00> : vector<16x16xf32>
    %84 = tpu.matmul %82, %83, %cst_62 {dimension_numbers = #tpu.dot_dimension_numbers<[1], [0], [0], [1], [0, 0, 1, 1], [], []>} : vector<16x67xf32>, vector<67x16xf32>, vector<16x16xf32> -> vector<16x16xf32>
    %cst_63 = arith.constant 0.000000e+00 : f32
    %85 = vector.broadcast %cst_63 : f32 to vector<16x16xf32>
    %86 = arith.maximumf %84, %85 : vector<16x16xf32>
    %c0_64 = arith.constant 0 : index
    %c0_65 = arith.constant 0 : index
    %87 = vector.load %arg14[%c0_64, %c0_65] : memref<16x50xf32, #tpu.memory_space<vmem>>, vector<16x50xf32>
    %cst_66 = arith.constant dense<0.000000e+00> : vector<16x50xf32>
    %88 = tpu.matmul %86, %87, %cst_66 {dimension_numbers = #tpu.dot_dimension_numbers<[1], [0], [0], [1], [0, 0, 1, 1], [], []>} : vector<16x16xf32>, vector<16x50xf32>, vector<16x50xf32> -> vector<16x50xf32>
    %89 = vector.extract_strided_slice %88 {offsets = [0, 0], sizes = [16, 36], strides = [1, 1]} : vector<16x50xf32> to vector<16x36xf32>
    %c0_67 = arith.constant 0 : index
    %c0_68 = arith.constant 0 : index
    %90 = vector.load %arg19[%c0_67, %c0_68] : memref<144x36xf32, #tpu.memory_space<vmem>>, vector<16x36xf32>
    tpu.vector_store %arg19[%c0_67, %c0_68], %89 {strides = array<i32>} : memref<144x36xf32, #tpu.memory_space<vmem>>, vector<16x36xf32>,
    %91 = vector.extract_strided_slice %88 {offsets = [0, 1], sizes = [16, 36], strides = [1, 1]} : vector<16x50xf32> to vector<16x36xf32>
    %c16_69 = arith.constant 16 : index
    %c0_70 = arith.constant 0 : index
    %92 = vector.load %arg19[%c16_69, %c0_70] : memref<144x36xf32, #tpu.memory_space<vmem>>, vector<16x36xf32>
    tpu.vector_store %arg19[%c16_69, %c0_70], %91 {strides = array<i32>} : memref<144x36xf32, #tpu.memory_space<vmem>>, vector<16x36xf32>,
    %93 = vector.extract_strided_slice %88 {offsets = [0, 2], sizes = [16, 36], strides = [1, 1]} : vector<16x50xf32> to vector<16x36xf32>
    %c32_71 = arith.constant 32 : index
    %c0_72 = arith.constant 0 : index
    %94 = vector.load %arg19[%c32_71, %c0_72] : memref<144x36xf32, #tpu.memory_space<vmem>>, vector<16x36xf32>
    tpu.vector_store %arg19[%c32_71, %c0_72], %93 {strides = array<i32>} : memref<144x36xf32, #tpu.memory_space<vmem>>, vector<16x36xf32>,
    %95 = vector.extract_strided_slice %88 {offsets = [0, 6], sizes = [16, 36], strides = [1, 1]} : vector<16x50xf32> to vector<16x36xf32>
    %c48_73 = arith.constant 48 : index
    %c0_74 = arith.constant 0 : index
    %96 = vector.load %arg19[%c48_73, %c0_74] : memref<144x36xf32, #tpu.memory_space<vmem>>, vector<16x36xf32>
    tpu.vector_store %arg19[%c48_73, %c0_74], %95 {strides = array<i32>} : memref<144x36xf32, #tpu.memory_space<vmem>>, vector<16x36xf32>,
    %97 = vector.extract_strided_slice %88 {offsets = [0, 7], sizes = [16, 36], strides = [1, 1]} : vector<16x50xf32> to vector<16x36xf32>
    %c64_75 = arith.constant 64 : index
    %c0_76 = arith.constant 0 : index
    %98 = vector.load %arg19[%c64_75, %c0_76] : memref<144x36xf32, #tpu.memory_space<vmem>>, vector<16x36xf32>
    tpu.vector_store %arg19[%c64_75, %c0_76], %97 {strides = array<i32>} : memref<144x36xf32, #tpu.memory_space<vmem>>, vector<16x36xf32>,
    %99 = vector.extract_strided_slice %88 {offsets = [0, 8], sizes = [16, 36], strides = [1, 1]} : vector<16x50xf32> to vector<16x36xf32>
    %c80_77 = arith.constant 80 : index
    %c0_78 = arith.constant 0 : index
    %100 = vector.load %arg19[%c80_77, %c0_78] : memref<144x36xf32, #tpu.memory_space<vmem>>, vector<16x36xf32>
    tpu.vector_store %arg19[%c80_77, %c0_78], %99 {strides = array<i32>} : memref<144x36xf32, #tpu.memory_space<vmem>>, vector<16x36xf32>,
    %101 = vector.extract_strided_slice %88 {offsets = [0, 12], sizes = [16, 36], strides = [1, 1]} : vector<16x50xf32> to vector<16x36xf32>
    %c96_79 = arith.constant 96 : index
    %c0_80 = arith.constant 0 : index
    %102 = vector.load %arg19[%c96_79, %c0_80] : memref<144x36xf32, #tpu.memory_space<vmem>>, vector<16x36xf32>
    tpu.vector_store %arg19[%c96_79, %c0_80], %101 {strides = array<i32>} : memref<144x36xf32, #tpu.memory_space<vmem>>, vector<16x36xf32>,
    %103 = vector.extract_strided_slice %88 {offsets = [0, 13], sizes = [16, 36], strides = [1, 1]} : vector<16x50xf32> to vector<16x36xf32>
    %c112_81 = arith.constant 112 : index
    %c0_82 = arith.constant 0 : index
    %104 = vector.load %arg19[%c112_81, %c0_82] : memref<144x36xf32, #tpu.memory_space<vmem>>, vector<16x36xf32>
    tpu.vector_store %arg19[%c112_81, %c0_82], %103 {strides = array<i32>} : memref<144x36xf32, #tpu.memory_space<vmem>>, vector<16x36xf32>,
    %105 = vector.extract_strided_slice %88 {offsets = [0, 14], sizes = [16, 36], strides = [1, 1]} : vector<16x50xf32> to vector<16x36xf32>
    %c128 = arith.constant 128 : index
    %c0_83 = arith.constant 0 : index
    %106 = vector.load %arg19[%c128, %c0_83] : memref<144x36xf32, #tpu.memory_space<vmem>>, vector<16x36xf32>
    tpu.vector_store %arg19[%c128, %c0_83], %105 {strides = array<i32>} : memref<144x36xf32, #tpu.memory_space<vmem>>, vector<16x36xf32>,
    %c0_84 = arith.constant 0 : index
    %c0_85 = arith.constant 0 : index
    %107 = vector.load %arg10[%c0_84, %c0_85] : memref<16x144xf32, #tpu.memory_space<vmem>>, vector<16x144xf32>
    %c0_86 = arith.constant 0 : index
    %c0_87 = arith.constant 0 : index
    %108 = vector.load %arg19[%c0_86, %c0_87] : memref<144x36xf32, #tpu.memory_space<vmem>>, vector<144x36xf32>
    %cst_88 = arith.constant dense<0.000000e+00> : vector<16x36xf32>
    %109 = tpu.matmul %107, %108, %cst_88 {dimension_numbers = #tpu.dot_dimension_numbers<[1], [0], [0], [1], [0, 0, 1, 1], [], []>} : vector<16x144xf32>, vector<144x36xf32>, vector<16x36xf32> -> vector<16x36xf32>
    %c0_89 = arith.constant 0 : index
    %c0_90 = arith.constant 0 : index
    %110 = vector.load %arg11[%c0_89, %c0_90] : memref<16x1xf32, #tpu.memory_space<vmem>>, vector<16x1xf32>
    %111 = vector.broadcast %110 : vector<16x1xf32> to vector<16x36xf32>
    %112 = arith.addf %109, %111 : vector<16x36xf32>
    %cst_91 = arith.constant 0.000000e+00 : f32
    %113 = vector.broadcast %cst_91 : f32 to vector<16x36xf32>
    %114 = arith.maximumf %112, %113 : vector<16x36xf32>
    %c0_92 = arith.constant 0 : index
    %c0_93 = arith.constant 0 : index
    %115 = vector.load %arg15[%c0_92, %c0_93] : memref<36x16xf32, #tpu.memory_space<vmem>>, vector<36x16xf32>
    %cst_94 = arith.constant dense<0.000000e+00> : vector<16x16xf32>
    %116 = tpu.matmul %114, %115, %cst_94 {dimension_numbers = #tpu.dot_dimension_numbers<[1], [0], [0], [1], [0, 0, 1, 1], [], []>} : vector<16x36xf32>, vector<36x16xf32>, vector<16x16xf32> -> vector<16x16xf32>
    %c0_95 = arith.constant 0 : index
    %c0_96 = arith.constant 0 : index
    %117 = vector.load %arg12[%c0_95, %c0_96] : memref<16x16xf32, #tpu.memory_space<vmem>>, vector<16x16xf32>
    %cst_97 = arith.constant dense<0.000000e+00> : vector<16x16xf32>
    %118 = tpu.matmul %117, %116, %cst_97 {dimension_numbers = #tpu.dot_dimension_numbers<[1], [0], [0], [1], [0, 0, 1, 1], [], []>} : vector<16x16xf32>, vector<16x16xf32>, vector<16x16xf32> -> vector<16x16xf32>
    %119 = arith.addf %84, %118 : vector<16x16xf32>
    %c0_98 = arith.constant 0 : index
    %c0_99 = arith.constant 0 : index
    %120 = vector.load %arg13[%c0_98, %c0_99] : memref<16x1xf32, #tpu.memory_space<vmem>>, vector<16x1xf32>
    %121 = vector.broadcast %120 : vector<16x1xf32> to vector<16x16xf32>
    %122 = arith.addf %119, %121 : vector<16x16xf32>
    %cst_100 = arith.constant 0.000000e+00 : f32
    %123 = vector.broadcast %cst_100 : f32 to vector<16x16xf32>
    %124 = arith.maximumf %122, %123 : vector<16x16xf32>
    %c0_101 = arith.constant 0 : index
    %c0_102 = arith.constant 0 : index
    %125 = vector.load %arg14[%c0_101, %c0_102] : memref<16x50xf32, #tpu.memory_space<vmem>>, vector<16x50xf32>
    %cst_103 = arith.constant dense<0.000000e+00> : vector<16x50xf32>
    %126 = tpu.matmul %124, %125, %cst_103 {dimension_numbers = #tpu.dot_dimension_numbers<[1], [0], [0], [1], [0, 0, 1, 1], [], []>} : vector<16x16xf32>, vector<16x50xf32>, vector<16x50xf32> -> vector<16x50xf32>
    %127 = vector.extract_strided_slice %126 {offsets = [0, 0], sizes = [16, 36], strides = [1, 1]} : vector<16x50xf32> to vector<16x36xf32>
    %c0_104 = arith.constant 0 : index
    %c0_105 = arith.constant 0 : index
    %128 = vector.load %arg19[%c0_104, %c0_105] : memref<144x36xf32, #tpu.memory_space<vmem>>, vector<16x36xf32>
    tpu.vector_store %arg19[%c0_104, %c0_105], %127 {strides = array<i32>} : memref<144x36xf32, #tpu.memory_space<vmem>>, vector<16x36xf32>,
    %129 = vector.extract_strided_slice %126 {offsets = [0, 1], sizes = [16, 36], strides = [1, 1]} : vector<16x50xf32> to vector<16x36xf32>
    %c16_106 = arith.constant 16 : index
    %c0_107 = arith.constant 0 : index
    %130 = vector.load %arg19[%c16_106, %c0_107] : memref<144x36xf32, #tpu.memory_space<vmem>>, vector<16x36xf32>
    tpu.vector_store %arg19[%c16_106, %c0_107], %129 {strides = array<i32>} : memref<144x36xf32, #tpu.memory_space<vmem>>, vector<16x36xf32>,
    %131 = vector.extract_strided_slice %126 {offsets = [0, 2], sizes = [16, 36], strides = [1, 1]} : vector<16x50xf32> to vector<16x36xf32>
    %c32_108 = arith.constant 32 : index
    %c0_109 = arith.constant 0 : index
    %132 = vector.load %arg19[%c32_108, %c0_109] : memref<144x36xf32, #tpu.memory_space<vmem>>, vector<16x36xf32>
    tpu.vector_store %arg19[%c32_108, %c0_109], %131 {strides = array<i32>} : memref<144x36xf32, #tpu.memory_space<vmem>>, vector<16x36xf32>,
    %133 = vector.extract_strided_slice %126 {offsets = [0, 6], sizes = [16, 36], strides = [1, 1]} : vector<16x50xf32> to vector<16x36xf32>
    %c48_110 = arith.constant 48 : index
    %c0_111 = arith.constant 0 : index
    %134 = vector.load %arg19[%c48_110, %c0_111] : memref<144x36xf32, #tpu.memory_space<vmem>>, vector<16x36xf32>
    tpu.vector_store %arg19[%c48_110, %c0_111], %133 {strides = array<i32>} : memref<144x36xf32, #tpu.memory_space<vmem>>, vector<16x36xf32>,
    %135 = vector.extract_strided_slice %126 {offsets = [0, 7], sizes = [16, 36], strides = [1, 1]} : vector<16x50xf32> to vector<16x36xf32>
    %c64_112 = arith.constant 64 : index
    %c0_113 = arith.constant 0 : index
    %136 = vector.load %arg19[%c64_112, %c0_113] : memref<144x36xf32, #tpu.memory_space<vmem>>, vector<16x36xf32>
    tpu.vector_store %arg19[%c64_112, %c0_113], %135 {strides = array<i32>} : memref<144x36xf32, #tpu.memory_space<vmem>>, vector<16x36xf32>,
    %137 = vector.extract_strided_slice %126 {offsets = [0, 8], sizes = [16, 36], strides = [1, 1]} : vector<16x50xf32> to vector<16x36xf32>
    %c80_114 = arith.constant 80 : index
    %c0_115 = arith.constant 0 : index
    %138 = vector.load %arg19[%c80_114, %c0_115] : memref<144x36xf32, #tpu.memory_space<vmem>>, vector<16x36xf32>
    tpu.vector_store %arg19[%c80_114, %c0_115], %137 {strides = array<i32>} : memref<144x36xf32, #tpu.memory_space<vmem>>, vector<16x36xf32>,
    %139 = vector.extract_strided_slice %126 {offsets = [0, 12], sizes = [16, 36], strides = [1, 1]} : vector<16x50xf32> to vector<16x36xf32>
    %c96_116 = arith.constant 96 : index
    %c0_117 = arith.constant 0 : index
    %140 = vector.load %arg19[%c96_116, %c0_117] : memref<144x36xf32, #tpu.memory_space<vmem>>, vector<16x36xf32>
    tpu.vector_store %arg19[%c96_116, %c0_117], %139 {strides = array<i32>} : memref<144x36xf32, #tpu.memory_space<vmem>>, vector<16x36xf32>,
    %141 = vector.extract_strided_slice %126 {offsets = [0, 13], sizes = [16, 36], strides = [1, 1]} : vector<16x50xf32> to vector<16x36xf32>
    %c112_118 = arith.constant 112 : index
    %c0_119 = arith.constant 0 : index
    %142 = vector.load %arg19[%c112_118, %c0_119] : memref<144x36xf32, #tpu.memory_space<vmem>>, vector<16x36xf32>
    tpu.vector_store %arg19[%c112_118, %c0_119], %141 {strides = array<i32>} : memref<144x36xf32, #tpu.memory_space<vmem>>, vector<16x36xf32>,
    %143 = vector.extract_strided_slice %126 {offsets = [0, 14], sizes = [16, 36], strides = [1, 1]} : vector<16x50xf32> to vector<16x36xf32>
    %c128_120 = arith.constant 128 : index
    %c0_121 = arith.constant 0 : index
    %144 = vector.load %arg19[%c128_120, %c0_121] : memref<144x36xf32, #tpu.memory_space<vmem>>, vector<16x36xf32>
    tpu.vector_store %arg19[%c128_120, %c0_121], %143 {strides = array<i32>} : memref<144x36xf32, #tpu.memory_space<vmem>>, vector<16x36xf32>,
    %c0_122 = arith.constant 0 : index
    %c0_123 = arith.constant 0 : index
    %145 = vector.load %arg10[%c0_122, %c0_123] : memref<16x144xf32, #tpu.memory_space<vmem>>, vector<16x144xf32>
    %c0_124 = arith.constant 0 : index
    %c0_125 = arith.constant 0 : index
    %146 = vector.load %arg19[%c0_124, %c0_125] : memref<144x36xf32, #tpu.memory_space<vmem>>, vector<144x36xf32>
    %cst_126 = arith.constant dense<0.000000e+00> : vector<16x36xf32>
    %147 = tpu.matmul %145, %146, %cst_126 {dimension_numbers = #tpu.dot_dimension_numbers<[1], [0], [0], [1], [0, 0, 1, 1], [], []>} : vector<16x144xf32>, vector<144x36xf32>, vector<16x36xf32> -> vector<16x36xf32>
    %c0_127 = arith.constant 0 : index
    %c0_128 = arith.constant 0 : index
    %148 = vector.load %arg11[%c0_127, %c0_128] : memref<16x1xf32, #tpu.memory_space<vmem>>, vector<16x1xf32>
    %149 = vector.broadcast %148 : vector<16x1xf32> to vector<16x36xf32>
    %150 = arith.addf %147, %149 : vector<16x36xf32>
    %cst_129 = arith.constant 0.000000e+00 : f32
    %151 = vector.broadcast %cst_129 : f32 to vector<16x36xf32>
    %152 = arith.maximumf %150, %151 : vector<16x36xf32>
    %c0_130 = arith.constant 0 : index
    %c0_131 = arith.constant 0 : index
    %153 = vector.load %arg15[%c0_130, %c0_131] : memref<36x16xf32, #tpu.memory_space<vmem>>, vector<36x16xf32>
    %cst_132 = arith.constant dense<0.000000e+00> : vector<16x16xf32>
    %154 = tpu.matmul %152, %153, %cst_132 {dimension_numbers = #tpu.dot_dimension_numbers<[1], [0], [0], [1], [0, 0, 1, 1], [], []>} : vector<16x36xf32>, vector<36x16xf32>, vector<16x16xf32> -> vector<16x16xf32>
    %c0_133 = arith.constant 0 : index
    %c0_134 = arith.constant 0 : index
    %155 = vector.load %arg12[%c0_133, %c0_134] : memref<16x16xf32, #tpu.memory_space<vmem>>, vector<16x16xf32>
    %cst_135 = arith.constant dense<0.000000e+00> : vector<16x16xf32>
    %156 = tpu.matmul %155, %154, %cst_135 {dimension_numbers = #tpu.dot_dimension_numbers<[1], [0], [0], [1], [0, 0, 1, 1], [], []>} : vector<16x16xf32>, vector<16x16xf32>, vector<16x16xf32> -> vector<16x16xf32>
    %157 = arith.addf %122, %156 : vector<16x16xf32>
    %c0_136 = arith.constant 0 : index
    %c0_137 = arith.constant 0 : index
    %158 = vector.load %arg13[%c0_136, %c0_137] : memref<16x1xf32, #tpu.memory_space<vmem>>, vector<16x1xf32>
    %159 = vector.broadcast %158 : vector<16x1xf32> to vector<16x16xf32>
    %160 = arith.addf %157, %159 : vector<16x16xf32>
    %cst_138 = arith.constant 0.000000e+00 : f32
    %161 = vector.broadcast %cst_138 : f32 to vector<16x16xf32>
    %162 = arith.maximumf %160, %161 : vector<16x16xf32>
    %163 = arith.addf %84, %162 : vector<16x16xf32>
    %c0_139 = arith.constant 0 : index
    %c0_140 = arith.constant 0 : index
    %c0_141 = arith.constant 0 : index
    %164 = vector.load %arg16[%c0_139, %c0_140, %c0_141] : memref<1x16x16xf32, #tpu.memory_space<vmem>>, vector<1x16x16xf32>
    %165 = vector.shape_cast %164 : vector<1x16x16xf32> to vector<16x16xf32>
    %166 = vector.shape_cast %163 : vector<16x16xf32> to vector<1x16x16xf32>
    tpu.vector_store %arg16[%c0_139, %c0_140, %c0_141], %166 {strides = array<i32>} : memref<1x16x16xf32, #tpu.memory_space<vmem>>, vector<1x16x16xf32>,
    return
  }
  func.func @transform_0(%arg0: i32) -> (i32, i32, i32) {
    %c0_i32 = arith.constant 0 : i32
    %c0_i32_0 = arith.constant 0 : i32
    %c0_i32_1 = arith.constant 0 : i32
    return %arg0, %c0_i32, %c0_i32_0 : i32, i32, i32
  }
  func.func @transform_1(%arg0: i32) -> (i32, i32) {
    %c0_i32 = arith.constant 0 : i32
    %c0_i32_0 = arith.constant 0 : i32
    %c0_i32_1 = arith.constant 0 : i32
    return %c0_i32, %c0_i32_0 : i32, i32
  }
  func.func @transform_2(%arg0: i32) -> (i32, i32) {
    %c0_i32 = arith.constant 0 : i32
    %c0_i32_0 = arith.constant 0 : i32
    %c0_i32_1 = arith.constant 0 : i32
    return %c0_i32, %c0_i32_0 : i32, i32
  }
  func.func @transform_3(%arg0: i32) -> (i32, i32) {
    %c0_i32 = arith.constant 0 : i32
    %c0_i32_0 = arith.constant 0 : i32
    %c0_i32_1 = arith.constant 0 : i32
    return %c0_i32, %c0_i32_0 : i32, i32
  }
  func.func @transform_4(%arg0: i32) -> (i32, i32) {
    %c0_i32 = arith.constant 0 : i32
    %c0_i32_0 = arith.constant 0 : i32
    %c0_i32_1 = arith.constant 0 : i32
    return %c0_i32, %c0_i32_0 : i32, i32
  }
  func.func @transform_5(%arg0: i32) -> (i32, i32) {
    %c0_i32 = arith.constant 0 : i32
    %c0_i32_0 = arith.constant 0 : i32
    %c0_i32_1 = arith.constant 0 : i32
    return %c0_i32, %c0_i32_0 : i32, i32
  }
  func.func @transform_6(%arg0: i32) -> (i32, i32) {
    %c0_i32 = arith.constant 0 : i32
    %c0_i32_0 = arith.constant 0 : i32
    %c0_i32_1 = arith.constant 0 : i32
    return %c0_i32, %c0_i32_0 : i32, i32
  }
  func.func @transform_7(%arg0: i32) -> (i32, i32) {
    %c0_i32 = arith.constant 0 : i32
    %c0_i32_0 = arith.constant 0 : i32
    %c0_i32_1 = arith.constant 0 : i32
    return %c0_i32, %c0_i32_0 : i32, i32
  }
  func.func @transform_8(%arg0: i32) -> (i32, i32) {
    %c0_i32 = arith.constant 0 : i32
    %c0_i32_0 = arith.constant 0 : i32
    %c0_i32_1 = arith.constant 0 : i32
    return %c0_i32, %c0_i32_0 : i32, i32
  }
  func.func @transform_9(%arg0: i32) -> (i32, i32) {
    %c0_i32 = arith.constant 0 : i32
    %c0_i32_0 = arith.constant 0 : i32
    %c0_i32_1 = arith.constant 0 : i32
    return %c0_i32, %c0_i32_0 : i32, i32
  }
  func.func @transform_10(%arg0: i32) -> (i32, i32) {
    %c0_i32 = arith.constant 0 : i32
    %c0_i32_0 = arith.constant 0 : i32
    %c0_i32_1 = arith.constant 0 : i32
    return %c0_i32, %c0_i32_0 : i32, i32
  }
  func.func @transform_11(%arg0: i32) -> (i32, i32) {
    %c0_i32 = arith.constant 0 : i32
    %c0_i32_0 = arith.constant 0 : i32
    %c0_i32_1 = arith.constant 0 : i32
    return %c0_i32, %c0_i32_0 : i32, i32
  }
  func.func @transform_12(%arg0: i32) -> (i32, i32) {
    %c0_i32 = arith.constant 0 : i32
    %c0_i32_0 = arith.constant 0 : i32
    %c0_i32_1 = arith.constant 0 : i32
    return %c0_i32, %c0_i32_0 : i32, i32
  }
  func.func @transform_13(%arg0: i32) -> (i32, i32) {
    %c0_i32 = arith.constant 0 : i32
    %c0_i32_0 = arith.constant 0 : i32
    %c0_i32_1 = arith.constant 0 : i32
    return %c0_i32, %c0_i32_0 : i32, i32
  }
  func.func @transform_14(%arg0: i32) -> (i32, i32) {
    %c0_i32 = arith.constant 0 : i32
    %c0_i32_0 = arith.constant 0 : i32
    %c0_i32_1 = arith.constant 0 : i32
    return %c0_i32, %c0_i32_0 : i32, i32
  }
  func.func @transform_15(%arg0: i32) -> (i32, i32, i32) {
    %c0_i32 = arith.constant 0 : i32
    %c0_i32_0 = arith.constant 0 : i32
    %c0_i32_1 = arith.constant 0 : i32
    return %arg0, %c0_i32, %c0_i32_0 : i32, i32, i32
  }
}

</mosaic_0001>

<bundles_post_ra>
// kernel: encoder_forward.1
= control target key start
LH: loop header
LB: loop body
LE: loop exit
PB: predicated region body
PF: predicated region fallthrough
CT: control target
= control target key end

     0   :  { %s1567_s18 = smov 0   ;;  %s1907_s0 = inlined_call_operand.vmem [shape: f32[2,64,122], index: 0, kind: input, shape index: {}]   ;;  %s1908_s1 = inlined_call_operand.vmem [shape: f32[1,122], index: 1, kind: input, shape index: {}]   ;;  %s1909_s2 = inlined_call_operand.vmem [shape: f32[8,64], index: 2, kind: input, shape index: {}]   ;;  %s1910_s3 = inlined_call_operand.vmem [shape: f32[8,1], index: 3, kind: input, shape index: {}]   ;;  %s1911_s4 = inlined_call_operand.vmem [shape: f32[8,72], index: 4, kind: input, shape index: {}]   ;;  %s1912_s5 = inlined_call_operand.vmem [shape: f32[8,1], index: 5, kind: input, shape index: {}]   ;;  %s1913_s6 = inlined_call_operand.vmem [shape: f32[16,128], index: 6, kind: input, shape index: {}]   ;;  %s1914_s7 = inlined_call_operand.vmem [shape: f32[16,1], index: 7, kind: input, shape index: {}]   ;;  %s1915_s8 = inlined_call_operand.vmem [shape: f32[67,16], index: 8, kind: input, shape index: {}]   ;;  %s1916_s9 = inlined_call_operand.vmem [shape: f32[16,144], index: 9, kind: input, shape index: {}]   ;;  %s1917_s10 = inlined_call_operand.vmem [shape: f32[16,1], index: 10, kind: input, shape index: {}]   ;;  %s1918_s11 = inlined_call_operand.vmem [shape: f32[16,16], index: 11, kind: input, shape index: {}]   ;;  %s1919_s12 = inlined_call_operand.vmem [shape: f32[16,1], index: 12, kind: input, shape index: {}]   ;;  %s1920_s13 = inlined_call_operand.vmem [shape: f32[16,50], index: 13, kind: input, shape index: {}]   ;;  %s1921_s14 = inlined_call_operand.vmem [shape: f32[36,16], index: 14, kind: input, shape index: {}]   ;;  %s1922_s15 = inlined_call_operand.vmem [shape: f32[2,16,16], index: 15, kind: output, shape index: {}]  }
   0x1 LB: > { %s1391_s19 = sadd.s32 4294967295, %s1465_s18   ;;  %p1395_p0 = scmp.ge.s32.totalorder %s1465_s18, 1  ;;  %s1465_s18 = sphi %s1567_s18, %s25_s18  }
   0x2   : > { %p437_p1 = scmp.lt.s32.totalorder %s1465_s18, 3 }
   0x4   : > { %p438_p2 = pnand %p1395_p0, %p437_p1 }
   0x5   : > { %p485_p3 = scmp.lt.s32.totalorder (!%p438_p2), %s1391_s19, 1  ;;  %s1468_s30 = smov (!%p438_p2), 116  }
   0x6   : > { %441 = sbr.rel (%p438_p2) target bundleno = 2290 (0x8f2), region = 80  ;;  %s1469_s16 = smov (!%p438_p2), 107  }
   0x7   : > { %s1470_s17 = smov (!%p438_p2), 106   ;;  %s1471_s20 = smov (!%p438_p2), 117  }
   0x8   : > { %s1472_s21 = smov (!%p438_p2), 108   ;;  %s1923_s26 = smov (!%p438_p2), 126  }
   0x9   : > { %s1476_s29 = smov (!%p438_p2), 97   ;;  %s1477_s23 = smov (!%p438_p2), 96  }
   0xa   : > { %s1478_s24 = smov (!%p438_p2), 95   ;;  %s1479_s27 = smov (!%p438_p2), 105  }
   0xb   : > { %v505_v0 = vld [vmem:[%s1910_s3] sm:$0xff]  ;;  %v1467_v1 = vmov 0   ;;  %s1933_s19 = smov (!%p485_p3, %s1391_s19), 1  ;;  %vm511_vm0 = vcmask 523264   ;;  %vm540_vm1 = vcmask 818176   ;;  %vm591_vm2 = vcmask 588800  }
   0xc   : > { %1455 = vset.pattern.permute.xlu0 %v1467_v1  ;;  %1456 = vset.pattern.permute.xlu2 %v1467_v1  ;;  %s1425_s22 = sshll.u32 %s1933_s19, 6  ;;  %v496_v10 = vld [vmem:[%s1909_s2] sm:$0xff]  ;;  %vm621_vm3 = vcmask 547840   ;;  %s1480_s28 = smov 98   ;;  %v703_v43 = vld [vmem:[%s1914_s7 + $0x8] sm:$0xff]  ;;  %vm754_vm4 = vcmask 1042432  }
   0xd   : > { %508 = vperm.xlu0 %1455, %v505_v0   ;;  %1457 = vset.pattern.permute.xlu1 %v1467_v1  ;;  %s489_s25 = scalar_lea.vmem %s1907_s0, %s1425_s22  ;;  %v1458_v14 = vld [vmem:[%s1908_s1] ss:$0 sm:$0xff]  ;;  %s1473_s22 = smov 118   ;;  %v746_v0 = vld [vmem:[%s1915_s8 + $0x38] sm:$0xff]  ;;  %vm785_vm5 = vcmask 130048   ;;  %vm815_vm6 = vcmask 293888  }
   0xe   : > { %v504_v2 = vld [vmem:[%s489_s25 + $0x38] sm:$0xff]  ;;  %v503_v3 = vld [vmem:[%s489_s25 + $0x30] sm:$0xff]  ;;  %v502_v4 = vld [vmem:[%s489_s25 + $0x28] sm:$0xff]  ;;  %vm983_vm7 = vcmask 1043456  }
   0xf   : > { %523 = vmatpush.msra.mxu0 %v504_v2  ;;  %v501_v5 = vld [vmem:[%s489_s25 + $0x20] sm:$0xff]  ;;  %v500_v6 = vld [vmem:[%s489_s25 + $0x18] sm:$0xff]  ;;  %v499_v7 = vld [vmem:[%s489_s25 + $0x10] sm:$0xff] }
  0x10   : > { %v498_v8 = vld [vmem:[%s489_s25 + $0x8] sm:$0xff]  ;;  %v497_v9 = vld [vmem:[%s489_s25] sm:$0xff]  ;;  %s1925_s25 = smov 127  }
  0x11   : > { %524 = vmatpush.msra.mxu0 %v503_v3  ;;  %v585_v17 = vld [vmem:[%s1912_s5] sm:$0xff] }
  0x12   : > { %v575_v34 = vld [vmem:[%s1911_s4] sm:$0xff] }
  0x13   : > { %525 = vmatpush.msra.mxu0 %v502_v4  ;;  %v702_v62 = vld [vmem:[%s1914_s7] sm:$0xff]  ;;  %v745_v4 = vld [vmem:[%s1915_s8 + $0x30] sm:$0xff] }
  0x14   : > { %v747_v63 = vld [vmem:[%s1915_s8 + $0x40] sm:$0x7] }
  0x15   : > { %526 = vmatpush.msra.mxu0 %v501_v5  ;;  %1402 = vmatpush.msk.msra.mxu3 %vm754_vm4, %v747_v63 }
  0x17   : > { %527 = vmatpush.msra.mxu0 %v500_v6  ;;  %766 = vmatpush.msra.mxu3 %v746_v0  ;;  %v744_v6 = vld [vmem:[%s1915_s8 + $0x28] sm:$0xff] }
  0x19   : > { %528 = vmatpush.msra.mxu0 %v499_v7  ;;  %767 = vmatpush.msra.mxu3 %v745_v4 }
  0x1b   : > { %529 = vmatpush.msra.mxu0 %v498_v8  ;;  %v743_v8 = vld [vmem:[%s1915_s8 + $0x20] sm:$0xff]  ;;  %768 = vmatpush.msra.mxu3 %v744_v6 }
  0x1d   : > { %530 = vmatpush.msra.mxu0 %v497_v9  ;;  %v742_v9 = vld [vmem:[%s1915_s8 + $0x18] sm:$0xff]  ;;  %769 = vmatpush.msra.mxu3 %v743_v8 }
  0x1e   : > { %1400 = vmatmul.msk.f32.vlgmr.msra.gmra.mxu0 %vm511_vm0, %v496_v10 }
  0x1f   : > { %770 = vmatpush.msra.mxu3 %v742_v9  ;;  %v1755_v9 = vld [vmem:[%s1916_s9 + $0x8] sm:$0xff] }
  0x7f   : > { %v509_v11 = vpop.permute.xlu0 %508 }
  0x9b   : > { %v532_v12 = vpop.f32.mrf.mxu0 }
  0x9c   : > { %v533_v13 = vadd.f32 %v532_v12, %v509_v11 }
  0x9e   : > { %v535_v15 = vmax.f32 %v533_v13, 0.0  ;;  %v741_v13 = vld [vmem:[%s1915_s8 + $0x10] sm:$0xff] }
  0x9f   : > { %771 = vmatpush.msra.mxu3 %v741_v13 }
  0xa0   : > { %v539_v16 = vmul.f32 %v1458_v14, %v535_v15 }
  0xa2   : > { %559 = vrot.lane.b32.xlu2 %v539_v16, %s1468_s30  ;;  %567 = vrot.lane.b32.xlu1 %v539_v16, %s1469_s16  ;;  %541 = vst.msk [vmem:[#allocation2] sm:$0xff] %vm540_vm1, %v539_v16 }
  0xa3   : > { %571 = vrot.lane.b32.xlu0 %v539_v16, %s1470_s17 }
  0xa9   : > { %v576_v35 = vld [vmem:[#allocation2] sm:$0xff] }
  0xaa   : > { %555 = vrot.lane.b32.xlu2 %v539_v16, %s1471_s20  ;;  %563 = vrot.lane.b32.xlu1 %v539_v16, %s1472_s21 }
  0xab   : > { %551 = vrot.lane.b32.xlu0 %v539_v16, %s1473_s22 }
  0xb2   : > { %543 = vrot.lane.b32.xlu2 %v539_v16, %s1925_s25  ;;  %547 = vrot.lane.b32.xlu1 %v539_v16, %s1923_s26  ;;  %s1481_s26 = smov 115  }
  0xb3   : > { %588 = vperm.xlu0 %1455, %v585_v17  }
  0xba   : > { %617 = vrot.lane.b32.xlu1 %v1458_v14, %s1471_s20 }
  0xfc   : > { %v560_v18 = vpop.permute.xlu2 %559 }
  0xfd   : > { %562 = vst.msk [vmem:[#allocation2 + $0x28] sm:$0xff] %vm540_vm1, %v560_v18  ;;  %v684_v18 = vld [vmem:[%s1913_s6] sm:$0xff] }
 0x104   : > { %v556_v19 = vpop.permute.xlu2 %555  ;;  %v581_v29 = vld [vmem:[#allocation2 + $0x28] sm:$0xff] }
 0x105   : > { %558 = vst.msk [vmem:[#allocation2 + $0x20] sm:$0xff] %vm540_vm1, %v556_v19 }
 0x10c   : > { %v544_v20 = vpop.permute.xlu2 %543  ;;  %v580_v30 = vld [vmem:[#allocation2 + $0x20] sm:$0xff] }
 0x10d   : > { %546 = vst.msk [vmem:[#allocation2 + $0x8] sm:$0xff] %vm540_vm1, %v544_v20  ;;  %v685_v20 = vld [vmem:[%s1913_s6 + $0x8] sm:$0xff] }
 0x114   : > { %v568_v21 = vpop.permute.xlu1 %567  ;;  %v577_v33 = vld [vmem:[#allocation2 + $0x8] sm:$0xff] }
 0x115   : > { %570 = vst.msk [vmem:[#allocation2 + $0x38] sm:$0xff] %vm540_vm1, %v568_v21  ;;  %v572_v22 = vpop.permute.xlu0 %571  ;;  %v740_v21 = vld [vmem:[%s1915_s8 + $0x8] sm:$0xff] }
 0x116   : > { %574 = vst.msk [vmem:[#allocation2 + $0x40] sm:$0xff] %vm540_vm1, %v572_v22  ;;  %772 = vmatpush.msra.mxu3 %v740_v21  ;;  %v739_v22 = vld [vmem:[%s1915_s8] sm:$0xff] }
 0x118   : > { %773 = vmatpush.msra.mxu3 %v739_v22 }
 0x11c   : > { %v564_v23 = vpop.permute.xlu1 %563  ;;  %v583_v26 = vld [vmem:[#allocation2 + $0x38] sm:$0xff] }
 0x11d   : > { %566 = vst.msk [vmem:[#allocation2 + $0x30] sm:$0xff] %vm540_vm1, %v564_v23  ;;  %v552_v24 = vpop.permute.xlu0 %551  ;;  %v584_v25 = vld [vmem:[#allocation2 + $0x40] sm:$0xff] }
 0x11e   : > { %554 = vst.msk [vmem:[#allocation2 + $0x18] sm:$0xff] %vm540_vm1, %v552_v24  ;;  %602 = vmatpush.msra.mxu1 %v584_v25 }
 0x120   : > { %603 = vmatpush.msra.mxu1 %v583_v26 }
 0x124   : > { %v548_v27 = vpop.permute.xlu1 %547  ;;  %v582_v28 = vld [vmem:[#allocation2 + $0x30] sm:$0xff] }
 0x125   : > { %550 = vst.msk [vmem:[#allocation2 + $0x10] sm:$0xff] %vm540_vm1, %v548_v27  ;;  %604 = vmatpush.msra.mxu1 %v582_v28  ;;  %v579_v31 = vld [vmem:[#allocation2 + $0x18] sm:$0xff]  ;;  %v589_v36 = vpop.permute.xlu0 %588 }
 0x127   : > { %605 = vmatpush.msra.mxu1 %v581_v29 }
 0x129   : > { %606 = vmatpush.msra.mxu1 %v580_v30 }
 0x12b   : > { %607 = vmatpush.msra.mxu1 %v579_v31  ;;  %v1683_v31 = vld [vmem:[%s1920_s13 + $0x8] sm:$0xff] }
 0x12c   : > { %v578_v32 = vld [vmem:[#allocation2 + $0x10] sm:$0xff]  ;;  %v618_v40 = vpop.permute.xlu1 %617  ;;  %806 = vmatpush.msrb.mxu0 %v1683_v31 }
 0x12d   : > { %608 = vmatpush.msra.mxu1 %v578_v32  ;;  %v1689_v32 = vld [vmem:[%s1920_s13] sm:$0xff] }
 0x12e   : > { %807 = vmatpush.msrb.mxu0 %v1689_v32 }
 0x12f   : > { %609 = vmatpush.msra.mxu1 %v577_v33 }
 0x131   : > { %610 = vmatpush.msra.mxu1 %v576_v35 }
 0x132   : > { %1401 = vmatmul.msk.f32.vlgmr.msra.gmra.mxu1 %vm591_vm2, %v575_v34 }
 0x1af   : > { %v612_v37 = vpop.f32.mrf.mxu1 }
 0x1b0   : > { %v613_v38 = vadd.f32 %v612_v37, %v589_v36 }
 0x1b2   : > { %v615_v39 = vmax.f32 %v613_v38, 0.0 }
 0x1b4   : > { %v616_v41 = vadd.f32 %v615_v39, %v556_v19  ;;  %v1720_v39 = vld [vmem:[%s1917_s10 + $0x8] sm:$0xff] }
 0x1b6   : > { %v620_v42 = vmul.f32 %v618_v40, %v616_v41  ;;  %v1725_v40 = vld [vmem:[%s1917_s10] sm:$0xff]  ;;  %v1733_v41 = vld [vmem:[%s1919_s12 + $0x8] sm:$0xff] }
 0x1b8   : > { %672 = vrot.lane.b32.xlu1 %v620_v42, %s1476_s29  ;;  %676 = vrot.lane.b32.xlu0 %v620_v42, %s1477_s23  ;;  %622 = vst.msk [vmem:[#allocation3] sm:$0xff] %vm621_vm3, %v620_v42  ;;  %s1482_s29 = smov 125  }
 0x1b9   : > { %680 = vrot.lane.b32.xlu2 %v620_v42, %s1478_s24  ;;  %s1930_s24 = smov 127  }
 0x1bf   : > { %v686_v19 = vld [vmem:[#allocation3] sm:$0xff] }
 0x1c0   : > { %660 = vrot.lane.b32.xlu1 %v620_v42, %s1470_s17  ;;  %664 = vrot.lane.b32.xlu0 %v620_v42, %s1479_s27  ;;  %s1929_s17 = smov 126   ;;  %s1927_s27 = smov 114  }
 0x1c1   : > { %668 = vrot.lane.b32.xlu2 %v620_v42, %s1480_s28 }
 0x1c8   : > { %648 = vrot.lane.b32.xlu1 %v620_v42, %s1481_s26  ;;  %652 = vrot.lane.b32.xlu0 %v620_v42, %s1472_s21  ;;  %s1484_s21 = smov 121  }
 0x1c9   : > { %656 = vrot.lane.b32.xlu2 %v620_v42, %s1469_s16 }
 0x1d0   : > { %636 = vrot.lane.b32.xlu1 %v620_v42, %s1473_s22  ;;  %640 = vrot.lane.b32.xlu0 %v620_v42, %s1471_s20  ;;  %s1483_s20 = smov 120   ;;  %s1485_s22 = smov 122  }
 0x1d1   : > { %644 = vrot.lane.b32.xlu2 %v620_v42, %s1468_s30 }
 0x1d8   : > { %624 = vrot.lane.b32.xlu1 %v620_v42, %s1925_s25  ;;  %628 = vrot.lane.b32.xlu0 %v620_v42, %s1929_s17 }
 0x1d9   : > { %632 = vrot.lane.b32.xlu2 %v620_v42, %s1482_s29 }
 0x1e0   : > { %711 = vperm.xlu0 %1455, %v703_v43  }
 0x1e1   : > { %706 = vperm.xlu2 %1456, %v702_v62  }
 0x213   : > { %v681_v44 = vpop.permute.xlu2 %680 }
 0x214   : > { %683 = vst.msk [vmem:[#allocation3 + $0x78] sm:$0xff] %vm621_vm3, %v681_v44 }
 0x21b   : > { %v669_v45 = vpop.permute.xlu2 %668  ;;  %v701_v46 = vld [vmem:[#allocation3 + $0x78] sm:$0xff] }
 0x21c   : > { %671 = vst.msk [vmem:[#allocation3 + $0x60] sm:$0xff] %vm621_vm3, %v669_v45  ;;  %714 = vmatpush.msra.mxu2 %v701_v46 }
 0x223   : > { %v657_v47 = vpop.permute.xlu2 %656  ;;  %v698_v56 = vld [vmem:[#allocation3 + $0x60] sm:$0xff] }
 0x224   : > { %659 = vst.msk [vmem:[#allocation3 + $0x48] sm:$0xff] %vm621_vm3, %v657_v47 }
 0x22a   : > { %v673_v48 = vpop.permute.xlu1 %672  ;;  %v677_v49 = vpop.permute.xlu0 %676 }
 0x22b   : > { %675 = vst.msk [vmem:[#allocation3 + $0x68] sm:$0xff] %vm621_vm3, %v673_v48  ;;  %v645_v50 = vpop.permute.xlu2 %644  ;;  %v695_v61 = vld [vmem:[#allocation3 + $0x48] sm:$0xff] }
 0x22c   : > { %679 = vst.msk [vmem:[#allocation3 + $0x70] sm:$0xff] %vm621_vm3, %v677_v49 }
 0x22d   : > { %647 = vst.msk [vmem:[#allocation3 + $0x30] sm:$0xff] %vm621_vm3, %v645_v50 }
 0x232   : > { %v661_v51 = vpop.permute.xlu1 %660  ;;  %v665_v52 = vpop.permute.xlu0 %664  ;;  %v699_v55 = vld [vmem:[#allocation3 + $0x68] sm:$0xff] }
 0x233   : > { %663 = vst.msk [vmem:[#allocation3 + $0x50] sm:$0xff] %vm621_vm3, %v661_v51  ;;  %v633_v53 = vpop.permute.xlu2 %632  ;;  %v700_v54 = vld [vmem:[#allocation3 + $0x70] sm:$0xff] }
 0x234   : > { %667 = vst.msk [vmem:[#allocation3 + $0x58] sm:$0xff] %vm621_vm3, %v665_v52  ;;  %715 = vmatpush.msra.mxu2 %v700_v54  ;;  %v692_v7 = vld [vmem:[#allocation3 + $0x30] sm:$0xff] }
 0x235   : > { %635 = vst.msk [vmem:[#allocation3 + $0x18] sm:$0xff] %vm621_vm3, %v633_v53 }
 0x236   : > { %716 = vmatpush.msra.mxu2 %v699_v55 }
 0x238   : > { %717 = vmatpush.msra.mxu2 %v698_v56 }
 0x23a   : > { %v649_v57 = vpop.permute.xlu1 %648  ;;  %v653_v58 = vpop.permute.xlu0 %652  ;;  %v696_v60 = vld [vmem:[#allocation3 + $0x50] sm:$0xff] }
 0x23b   : > { %651 = vst.msk [vmem:[#allocation3 + $0x38] sm:$0xff] %vm621_vm3, %v649_v57  ;;  %v697_v59 = vld [vmem:[#allocation3 + $0x58] sm:$0xff]  ;;  %v707_v23 = vpop.permute.xlu2 %706 }
 0x23c   : > { %655 = vst.msk [vmem:[#allocation3 + $0x40] sm:$0xff] %vm621_vm3, %v653_v58  ;;  %718 = vmatpush.msra.mxu2 %v697_v59  ;;  %v689_v15 = vld [vmem:[#allocation3 + $0x18] sm:$0xff] }
 0x23e   : > { %719 = vmatpush.msra.mxu2 %v696_v60 }
 0x240   : > { %720 = vmatpush.msra.mxu2 %v695_v61 }
 0x242   : > { %v637_v1 = vpop.permute.xlu1 %636  ;;  %v641_v2 = vpop.permute.xlu0 %640  ;;  %v693_v5 = vld [vmem:[#allocation3 + $0x38] sm:$0xff] }
 0x243   : > { %639 = vst.msk [vmem:[#allocation3 + $0x20] sm:$0xff] %vm621_vm3, %v637_v1  ;;  %v694_v3 = vld [vmem:[#allocation3 + $0x40] sm:$0xff] }
 0x244   : > { %643 = vst.msk [vmem:[#allocation3 + $0x28] sm:$0xff] %vm621_vm3, %v641_v2  ;;  %721 = vmatpush.msra.mxu2 %v694_v3 }
 0x246   : > { %722 = vmatpush.msra.mxu2 %v693_v5 }
 0x248   : > { %723 = vmatpush.msra.mxu2 %v692_v7 }
 0x24a   : > { %v625_v10 = vpop.permute.xlu1 %624  ;;  %v629_v11 = vpop.permute.xlu0 %628  ;;  %v690_v14 = vld [vmem:[#allocation3 + $0x20] sm:$0xff] }
 0x24b   : > { %627 = vst.msk [vmem:[#allocation3 + $0x8] sm:$0xff] %vm621_vm3, %v625_v10  ;;  %v691_v12 = vld [vmem:[#allocation3 + $0x28] sm:$0xff] }
 0x24c   : > { %631 = vst.msk [vmem:[#allocation3 + $0x10] sm:$0xff] %vm621_vm3, %v629_v11  ;;  %724 = vmatpush.msra.mxu2 %v691_v12  ;;  %v1762_v12 = vld [vmem:[%s1916_s9] sm:$0xff] }
 0x24e   : > { %725 = vmatpush.msra.mxu2 %v690_v14  ;;  %v1770_v14 = vld [vmem:[%s1916_s9 + $0x18] sm:$0xff] }
 0x250   : > { %726 = vmatpush.msra.mxu2 %v689_v15  ;;  %v1777_v15 = vld [vmem:[%s1916_s9 + $0x10] sm:$0xff] }
 0x252   : > { %v687_v17 = vld [vmem:[#allocation3 + $0x8] sm:$0xff]  ;;  %v712_v27 = vpop.permute.xlu0 %711 }
 0x253   : > { %v688_v16 = vld [vmem:[#allocation3 + $0x10] sm:$0xff] }
 0x254   : > { %727 = vmatpush.msra.mxu2 %v688_v16  ;;  %v976_v16 = vld [vmem:[%s1921_s14 + $0x20] sm:$0xf] }
 0x255   : > { %1409 = vmatpush.msk.msra.mxu0 %vm983_vm7, %v976_v16 }
 0x256   : > { %728 = vmatpush.msra.mxu2 %v687_v17  ;;  %v1787_v17 = vld [vmem:[%s1921_s14 + $0x18] sm:$0xff] }
 0x257   : > { %999 = vmatpush.msra.mxu0 %v1787_v17 }
 0x258   : > { %729 = vmatpush.msra.mxu2 %v686_v19  ;;  %v1799_v19 = vld [vmem:[%s1921_s14 + $0x8] sm:$0xff] }
 0x259   : > { %730 = vmatmul.f32.vlgmr.msra.gmra.mxu2 %v684_v18  ;;  %v1793_v18 = vld [vmem:[%s1921_s14 + $0x10] sm:$0xff] }
 0x25a   : > { %1000 = vmatpush.msra.mxu0 %v1793_v18 }
 0x25c   : > { %1001 = vmatpush.msra.mxu0 %v1799_v19 }
 0x261   : > { %733 = vmatmul.f32.gmra.mxu2 %v685_v20  ;;  %v1805_v20 = vld [vmem:[%s1921_s14] sm:$0xff] }
 0x262   : > { %1002 = vmatpush.msra.mxu0 %v1805_v20 }
 0x2dc   : > { %v731_v24 = vpop.f32.mrf.mxu2 }
 0x2dd   : > { %v732_v25 = vadd.f32 %v731_v24, %v707_v23 }
 0x2df   : > { %v737_v26 = vmax.f32 %v732_v25, 0.0 }
 0x2e1   : > { %1403 = vmatmul.msk.f32.vlgmr.msra.gmra.mxu3 %vm621_vm3, %v737_v26 }
 0x2e4   : > { %v734_v28 = vpop.f32.mrf.mxu2 }
 0x2e5   : > { %v735_v29 = vadd.f32 %v734_v28, %v712_v27 }
 0x2e7   : > { %v738_v30 = vmax.f32 %v735_v29, 0.0 }
 0x2e9   : > { %1404 = vmatmul.msk.f32.gmra.mxu3 %vm621_vm3, %v738_v30 }
 0x364   : > { %v1692_v33 = vpop.f32.mrf.mxu3 }
 0x365   : > { %v781_v34 = vmax.f32 %v1692_v33, 0.0 }
 0x367   : > { %1405 = vmatmul.msk.f32.vlgmr.msrb.gmra.mxu0 %vm785_vm5, %v781_v34  ;;  %v1043_v34 = vld [vmem:[%s1919_s12] sm:$0xff] }
 0x36c   : > { %v1696_v35 = vpop.f32.mrf.mxu3 }
 0x36d   : > { %v782_v36 = vmax.f32 %v1696_v35, 0.0 }
 0x36f   : > { %1406 = vmatmul.msk.f32.gmra.mxu0 %vm785_vm5, %v782_v36 }
 0x3e4   : > { %v809_v37 = vpop.f32.mrf.mxu0 }
 0x3e5   : > { %816 = vst.msk [vmem:[#allocation4] sm:$0xff] %vm815_vm6, %v809_v37  ;;  %852 = vrot.lane.b32.xlu0 %v809_v37, %s1483_s20  ;;  %860 = vrot.lane.b32.xlu1 %v809_v37, %s1468_s30 }
 0x3e6   : > { %868 = vrot.lane.b32.xlu2 %v809_v37, %s1481_s26 }
 0x3ec   : > { %v812_v38 = vpop.f32.mrf.mxu0  ;;  %v888_v13 = vld [vmem:[#allocation4] sm:$0xff] }
 0x3ed   : > { %817 = vst.msk [vmem:[#allocation4 + $0x8] sm:$0xff] %vm815_vm6, %v812_v38  ;;  %862 = vrot.lane.b32.xlu0 %v812_v38, %s1468_s30  ;;  %870 = vrot.lane.b32.xlu1 %v812_v38, %s1481_s26 }
 0x3ee   : > { %844 = vrot.lane.b32.xlu2 %v809_v37, %s1484_s21 }
 0x3f4   : > { %v889_v11 = vld [vmem:[#allocation4 + $0x8] sm:$0xff] }
 0x3f5   : > { %838 = vrot.lane.b32.xlu0 %v812_v38, %s1485_s22  ;;  %836 = vrot.lane.b32.xlu1 %v809_v37, %s1485_s22 }
 0x3f6   : > { %854 = vrot.lane.b32.xlu2 %v812_v38, %s1483_s20 }
 0x3fd   : > { %828 = vrot.lane.b32.xlu0 %v809_v37, %s1929_s17  ;;  %846 = vrot.lane.b32.xlu1 %v812_v38, %s1484_s21 }
 0x3fe   : > { %830 = vrot.lane.b32.xlu2 %v812_v38, %s1929_s17 }
 0x405   : > { %820 = vrot.lane.b32.xlu0 %v809_v37, %s1925_s25  ;;  %822 = vrot.lane.b32.xlu1 %v812_v38, %s1925_s25 }
 0x406   : > { %878 = vrot.lane.b32.xlu2 %v812_v38, %s1927_s27  ;;  %v1816_v38 = vld [vmem:[%s1918_s11] sm:$0xff] }
 0x40d   : > { %915 = vperm.xlu0 %1455, %v1720_v39   ;;  %876 = vrot.lane.b32.xlu1 %v809_v37, %s1927_s27 }
 0x40e   : > { %910 = vperm.xlu2 %1456, %v1725_v40  }
 0x415   : > { %1047 = vperm.xlu1 %1457, %v1043_v34  }
 0x416   : > { %1052 = vperm.xlu2 %1456, %v1733_v41  }
 0x440   : > { %v869_v42 = vpop.permute.xlu2 %868 }
 0x441   : > { %874 = vst.msk [vmem:[#allocation4 + $0x70] sm:$0xff] %vm815_vm6, %v869_v42  ;;  %v1823_v42 = vld [vmem:[%s1918_s11 + $0x8] sm:$0xff] }
 0x448   : > { %v845_v43 = vpop.permute.xlu2 %844  ;;  %v902_v55 = vld [vmem:[#allocation4 + $0x70] sm:$0xff] }
 0x449   : > { %850 = vst.msk [vmem:[#allocation4 + $0x40] sm:$0xff] %vm815_vm6, %v845_v43 }
 0x450   : > { %v855_v44 = vpop.permute.xlu2 %854  ;;  %v896_v1 = vld [vmem:[#allocation4 + $0x40] sm:$0xff] }
 0x451   : > { %859 = vst.msk [vmem:[#allocation4 + $0x58] sm:$0xff] %vm815_vm6, %v855_v44 }
 0x457   : > { %v853_v45 = vpop.permute.xlu0 %852  ;;  %v861_v46 = vpop.permute.xlu1 %860 }
 0x458   : > { %858 = vst.msk [vmem:[#allocation4 + $0x50] sm:$0xff] %vm815_vm6, %v853_v45  ;;  %v831_v47 = vpop.permute.xlu2 %830  ;;  %v899_v60 = vld [vmem:[#allocation4 + $0x58] sm:$0xff] }
 0x459   : > { %866 = vst.msk [vmem:[#allocation4 + $0x60] sm:$0xff] %vm815_vm6, %v861_v46 }
 0x45a   : > { %835 = vst.msk [vmem:[#allocation4 + $0x28] sm:$0xff] %vm815_vm6, %v831_v47 }
 0x45f   : > { %v863_v48 = vpop.permute.xlu0 %862  ;;  %v871_v49 = vpop.permute.xlu1 %870  ;;  %v898_v61 = vld [vmem:[#allocation4 + $0x50] sm:$0xff] }
 0x460   : > { %v879_v50 = vpop.permute.xlu2 %878  ;;  %867 = vst.msk [vmem:[#allocation4 + $0x68] sm:$0xff] %vm815_vm6, %v863_v48  ;;  %v900_v57 = vld [vmem:[#allocation4 + $0x60] sm:$0xff] }
 0x461   : > { %883 = vst.msk [vmem:[#allocation4 + $0x88] sm:$0xff] %vm815_vm6, %v879_v50  ;;  %v893_v5 = vld [vmem:[#allocation4 + $0x28] sm:$0xff] }
 0x462   : > { %875 = vst.msk [vmem:[#allocation4 + $0x78] sm:$0xff] %vm815_vm6, %v871_v49 }
 0x467   : > { %v839_v51 = vpop.permute.xlu0 %838  ;;  %v837_v52 = vpop.permute.xlu1 %836  ;;  %v901_v56 = vld [vmem:[#allocation4 + $0x68] sm:$0xff] }
 0x468   : > { %843 = vst.msk [vmem:[#allocation4 + $0x38] sm:$0xff] %vm815_vm6, %v839_v51  ;;  %v905_v53 = vld [vmem:[#allocation4 + $0x88] sm:$0xff]  ;;  %v911_v22 = vpop.permute.xlu2 %910 }
 0x469   : > { %842 = vst.msk [vmem:[#allocation4 + $0x30] sm:$0xff] %vm815_vm6, %v837_v52  ;;  %v903_v54 = vld [vmem:[#allocation4 + $0x78] sm:$0xff]  ;;  %961 = vmatpush.msrb.mxu3 %v905_v53 }
 0x46a   : > { %924 = vmatpush.msrb.mxu1 %v903_v54 }
 0x46c   : > { %925 = vmatpush.msrb.mxu1 %v902_v55 }
 0x46e   : > { %926 = vmatpush.msrb.mxu1 %v901_v56 }
 0x46f   : > { %v829_v58 = vpop.permute.xlu0 %828  ;;  %v847_v59 = vpop.permute.xlu1 %846  ;;  %v895_v2 = vld [vmem:[#allocation4 + $0x38] sm:$0xff] }
 0x470   : > { %927 = vmatpush.msrb.mxu1 %v900_v57  ;;  %834 = vst.msk [vmem:[#allocation4 + $0x20] sm:$0xff] %vm815_vm6, %v829_v58  ;;  %v894_v3 = vld [vmem:[#allocation4 + $0x30] sm:$0xff]  ;;  %v1053_v50 = vpop.permute.xlu2 %1052 }
 0x471   : > { %851 = vst.msk [vmem:[#allocation4 + $0x48] sm:$0xff] %vm815_vm6, %v847_v59 }
 0x472   : > { %928 = vmatpush.msrb.mxu1 %v899_v60 }
 0x474   : > { %929 = vmatpush.msrb.mxu1 %v898_v61 }
 0x477   : > { %v821_v62 = vpop.permute.xlu0 %820  ;;  %v823_v63 = vpop.permute.xlu1 %822  ;;  %v892_v6 = vld [vmem:[#allocation4 + $0x20] sm:$0xff] }
 0x478   : > { %826 = vst.msk [vmem:[#allocation4 + $0x10] sm:$0xff] %vm815_vm6, %v821_v62  ;;  %v897_v0 = vld [vmem:[#allocation4 + $0x48] sm:$0xff] }
 0x479   : > { %827 = vst.msk [vmem:[#allocation4 + $0x18] sm:$0xff] %vm815_vm6, %v823_v63  ;;  %930 = vmatpush.msrb.mxu1 %v897_v0 }
 0x47b   : > { %931 = vmatpush.msrb.mxu1 %v896_v1 }
 0x47d   : > { %932 = vmatpush.msrb.mxu1 %v895_v2 }
 0x47f   : > { %933 = vmatpush.msrb.mxu1 %v894_v3  ;;  %v877_v4 = vpop.permute.xlu1 %876  ;;  %v890_v8 = vld [vmem:[#allocation4 + $0x10] sm:$0xff]  ;;  %v916_v28 = vpop.permute.xlu0 %915 }
 0x480   : > { %882 = vst.msk [vmem:[#allocation4 + $0x80] sm:$0xff] %vm815_vm6, %v877_v4  ;;  %v891_v7 = vld [vmem:[#allocation4 + $0x18] sm:$0xff] }
 0x481   : > { %934 = vmatpush.msrb.mxu1 %v893_v5 }
 0x483   : > { %935 = vmatpush.msrb.mxu1 %v892_v6 }
 0x485   : > { %936 = vmatpush.msrb.mxu1 %v891_v7 }
 0x487   : > { %937 = vmatpush.msrb.mxu1 %v890_v8  ;;  %v904_v10 = vld [vmem:[#allocation4 + $0x80] sm:$0xff]  ;;  %v1048_v44 = vpop.permute.xlu1 %1047 }
 0x488   : > { %962 = vmatpush.msrb.mxu3 %v904_v10 }
 0x489   : > { %938 = vmatpush.msrb.mxu1 %v889_v11  ;;  %1407 = vmatmul.msk.f32.vlgmr.msrb.gmra.mxu3 %vm785_vm5, %v1755_v9 }
 0x48a   : > { %1081 = vmatpush.msra.mxu3 %v1683_v31 }
 0x48b   : > { %939 = vmatpush.msrb.mxu1 %v888_v13 }
 0x48c   : > { %940 = vmatmul.f32.vlgmr.msrb.gmra.mxu1 %v1762_v12  ;;  %1082 = vmatpush.msra.mxu3 %v1689_v32 }
 0x491   : > { %1408 = vmatmul.msk.f32.gmra.mxu3 %vm785_vm5, %v1770_v14 }
 0x494   : > { %943 = vmatmul.f32.gmra.mxu1 %v1777_v15 }
 0x509   : > { %v941_v21 = vpop.f32.mrf.mxu1 }
 0x50a   : > { %v942_v23 = vadd.f32 %v941_v21, %v911_v22 }
 0x50c   : > { %v964_v24 = vpop.f32.mrf.mxu3 }
 0x50d   : > { %v965_v25 = vadd.f32 %v964_v24, %v942_v23 }
 0x50f   : > { %v970_v26 = vmax.f32 %v965_v25, 0.0 }
 0x511   : > { %v944_v27 = vpop.f32.mrf.mxu1  ;;  %1410 = vmatmul.msk.f32.vlgmr.msra.gmra.mxu0 %vm815_vm6, %v970_v26 }
 0x512   : > { %v945_v29 = vadd.f32 %v944_v27, %v916_v28 }
 0x514   : > { %v967_v30 = vpop.f32.mrf.mxu3 }
 0x515   : > { %v968_v31 = vadd.f32 %v967_v30, %v945_v29  ;;  %v1250_v30 = vld [vmem:[%s1921_s14 + $0x20] sm:$0xf] }
 0x516   : > { %1418 = vmatpush.msk.msra.mxu1 %vm983_vm7, %v1250_v30 }
 0x517   : > { %v971_v32 = vmax.f32 %v968_v31, 0.0 }
 0x518   : > { %1272 = vmatpush.msra.mxu1 %v1787_v17 }
 0x519   : > { %1411 = vmatmul.msk.f32.gmra.mxu0 %vm815_vm6, %v971_v32 }
 0x51a   : > { %1273 = vmatpush.msra.mxu1 %v1793_v18 }
 0x51c   : > { %1274 = vmatpush.msra.mxu1 %v1799_v19 }
 0x51e   : > { %1275 = vmatpush.msra.mxu1 %v1805_v20 }
 0x58e   : > { %v1004_v36 = vpop.f32.mrf.mxu0 }
 0x596   : > { %v1007_v37 = vpop.f32.mrf.mxu0 }
 0x597   : > { %1032 = vmatpush.msrb.mxu2 %v1007_v37 }
 0x599   : > { %1033 = vmatpush.msrb.mxu2 %v1004_v36 }
 0x59a   : > { %1412 = vmatmul.msk.f32.vlgmr.msrb.gmra.mxu2 %vm785_vm5, %v1816_v38 }
 0x5a2   : > { %1413 = vmatmul.msk.f32.gmra.mxu2 %vm785_vm5, %v1823_v42 }
 0x61d   : > { %v1035_v43 = vpop.f32.mrf.mxu2 }
 0x61e   : > { %v1041_v45 = vadd.f32 %v1035_v43, %v1692_v33 }
 0x620   : > { %v1828_v46 = vadd.f32 %v1048_v44, %v1041_v45 }
 0x622   : > { %v1057_v47 = vmax.f32 %v1828_v46, 0.0 }
 0x624   : > { %1414 = vmatmul.msk.f32.vlgmr.msra.gmra.mxu3 %vm785_vm5, %v1057_v47 }
 0x625   : > { %v1038_v48 = vpop.f32.mrf.mxu2 }
 0x626   : > { %v1042_v49 = vadd.f32 %v1038_v48, %v1696_v35 }
 0x628   : > { %v1833_v51 = vadd.f32 %v1053_v50, %v1042_v49 }
 0x62a   : > { %v1058_v52 = vmax.f32 %v1833_v51, 0.0 }
 0x62c   : > { %1415 = vmatmul.msk.f32.gmra.mxu3 %vm785_vm5, %v1058_v52 }
 0x6a7   : > { %v1084_v53 = vpop.f32.mrf.mxu3 }
 0x6a8   : > { %1090 = vst.msk [vmem:[#allocation4] sm:$0xff] %vm815_vm6, %v1084_v53  ;;  %1126 = vrot.lane.b32.xlu2 %v1084_v53, %s1483_s20  ;;  %1134 = vrot.lane.b32.xlu0 %v1084_v53, %s1468_s30 }
 0x6a9   : > { %1142 = vrot.lane.b32.xlu1 %v1084_v53, %s1481_s26 }
 0x6af   : > { %v1087_v54 = vpop.f32.mrf.mxu3  ;;  %v1162_v29 = vld [vmem:[#allocation4] sm:$0xff] }
 0x6b0   : > { %1091 = vst.msk [vmem:[#allocation4 + $0x8] sm:$0xff] %vm815_vm6, %v1087_v54  ;;  %1136 = vrot.lane.b32.xlu2 %v1087_v54, %s1468_s30  ;;  %1144 = vrot.lane.b32.xlu0 %v1087_v54, %s1481_s26  ;;  %s1931_s30 = smov 114  }
 0x6b1   : > { %1118 = vrot.lane.b32.xlu1 %v1084_v53, %s1484_s21 }
 0x6b7   : > { %v1163_v27 = vld [vmem:[#allocation4 + $0x8] sm:$0xff] }
 0x6b8   : > { %1112 = vrot.lane.b32.xlu2 %v1087_v54, %s1485_s22  ;;  %1110 = vrot.lane.b32.xlu0 %v1084_v53, %s1485_s22 }
 0x6b9   : > { %1128 = vrot.lane.b32.xlu1 %v1087_v54, %s1483_s20  ;;  %s1426_s20 = sshll.u32 %s1933_s19, 4 }
 0x6ba   : > { %s494_s27 = scalar_lea.vmem %s1922_s15, %s1426_s20 }
 0x6c0   : > { %1102 = vrot.lane.b32.xlu2 %v1084_v53, %s1929_s17  ;;  %1120 = vrot.lane.b32.xlu0 %v1087_v54, %s1484_s21 }
 0x6c1   : > { %1104 = vrot.lane.b32.xlu1 %v1087_v54, %s1929_s17 }
 0x6c8   : > { %1094 = vrot.lane.b32.xlu2 %v1084_v53, %s1930_s24  ;;  %1096 = vrot.lane.b32.xlu0 %v1087_v54, %s1930_s24 }
 0x6c9   : > { %1152 = vrot.lane.b32.xlu1 %v1087_v54, %s1931_s30 }
 0x6d0   : > { %1189 = vperm.xlu2 %1456, %v1720_v39   ;;  %1150 = vrot.lane.b32.xlu0 %v1084_v53, %s1931_s30 }
 0x6d1   : > { %1184 = vperm.xlu1 %1457, %v1725_v40  }
 0x6d8   : > { %1320 = vperm.xlu0 %1455, %v1043_v34  }
 0x6d9   : > { %1325 = vperm.xlu1 %1457, %v1733_v41  }
 0x702   : > { %v1127_v55 = vpop.permute.xlu2 %1126 }
 0x703   : > { %1132 = vst.msk [vmem:[#allocation4 + $0x50] sm:$0xff] %vm815_vm6, %v1127_v55 }
 0x70a   : > { %v1137_v56 = vpop.permute.xlu2 %1136  ;;  %v1172_v6 = vld [vmem:[#allocation4 + $0x50] sm:$0xff] }
 0x70b   : > { %1141 = vst.msk [vmem:[#allocation4 + $0x68] sm:$0xff] %vm815_vm6, %v1137_v56 }
 0x712   : > { %v1113_v57 = vpop.permute.xlu2 %1112  ;;  %v1175_v1 = vld [vmem:[#allocation4 + $0x68] sm:$0xff] }
 0x713   : > { %1117 = vst.msk [vmem:[#allocation4 + $0x38] sm:$0xff] %vm815_vm6, %v1113_v57 }
 0x71a   : > { %v1135_v58 = vpop.permute.xlu0 %1134  ;;  %v1103_v59 = vpop.permute.xlu2 %1102  ;;  %v1169_v13 = vld [vmem:[#allocation4 + $0x38] sm:$0xff] }
 0x71b   : > { %1140 = vst.msk [vmem:[#allocation4 + $0x60] sm:$0xff] %vm815_vm6, %v1135_v58  ;;  %v1143_v39 = vpop.permute.xlu1 %1142 }
 0x71c   : > { %1148 = vst.msk [vmem:[#allocation4 + $0x70] sm:$0xff] %vm815_vm6, %v1143_v39 }
 0x71d   : > { %1108 = vst.msk [vmem:[#allocation4 + $0x20] sm:$0xff] %vm815_vm6, %v1103_v59 }
 0x722   : > { %v1095_v40 = vpop.permute.xlu2 %1094  ;;  %v1145_v41 = vpop.permute.xlu0 %1144  ;;  %v1174_v2 = vld [vmem:[#allocation4 + $0x60] sm:$0xff] }
 0x723   : > { %v1119_v60 = vpop.permute.xlu1 %1118  ;;  %1100 = vst.msk [vmem:[#allocation4 + $0x10] sm:$0xff] %vm815_vm6, %v1095_v40  ;;  %v1176_v0 = vld [vmem:[#allocation4 + $0x70] sm:$0xff] }
 0x724   : > { %1124 = vst.msk [vmem:[#allocation4 + $0x40] sm:$0xff] %vm815_vm6, %v1119_v60  ;;  %v1166_v24 = vld [vmem:[#allocation4 + $0x20] sm:$0xff] }
 0x725   : > { %1149 = vst.msk [vmem:[#allocation4 + $0x78] sm:$0xff] %vm815_vm6, %v1145_v41 }
 0x72a   : > { %v1111_v61 = vpop.permute.xlu0 %1110  ;;  %v1164_v26 = vld [vmem:[#allocation4 + $0x10] sm:$0xff]  ;;  %v1190_v36 = vpop.permute.xlu2 %1189 }
 0x72b   : > { %v1129_v62 = vpop.permute.xlu1 %1128  ;;  %1116 = vst.msk [vmem:[#allocation4 + $0x30] sm:$0xff] %vm815_vm6, %v1111_v61  ;;  %v1170_v11 = vld [vmem:[#allocation4 + $0x40] sm:$0xff] }
 0x72c   : > { %1133 = vst.msk [vmem:[#allocation4 + $0x58] sm:$0xff] %vm815_vm6, %v1129_v62  ;;  %v1177_v63 = vld [vmem:[#allocation4 + $0x78] sm:$0xff] }
 0x72d   : > { %1198 = vmatpush.msrb.mxu0 %v1177_v63 }
 0x72f   : > { %1199 = vmatpush.msrb.mxu0 %v1176_v0 }
 0x731   : > { %1200 = vmatpush.msrb.mxu0 %v1175_v1 }
 0x732   : > { %v1121_v3 = vpop.permute.xlu0 %1120  ;;  %v1168_v16 = vld [vmem:[#allocation4 + $0x30] sm:$0xff] }
 0x733   : > { %1201 = vmatpush.msrb.mxu0 %v1174_v2  ;;  %v1105_v4 = vpop.permute.xlu1 %1104  ;;  %1125 = vst.msk [vmem:[#allocation4 + $0x48] sm:$0xff] %vm815_vm6, %v1121_v3  ;;  %v1173_v5 = vld [vmem:[#allocation4 + $0x58] sm:$0xff] }
 0x734   : > { %1109 = vst.msk [vmem:[#allocation4 + $0x28] sm:$0xff] %vm815_vm6, %v1105_v4 }
 0x735   : > { %1202 = vmatpush.msrb.mxu0 %v1173_v5 }
 0x737   : > { %1203 = vmatpush.msrb.mxu0 %v1172_v6 }
 0x73a   : > { %v1097_v7 = vpop.permute.xlu0 %1096  ;;  %v1171_v8 = vld [vmem:[#allocation4 + $0x48] sm:$0xff] }
 0x73b   : > { %v1153_v10 = vpop.permute.xlu1 %1152  ;;  %1101 = vst.msk [vmem:[#allocation4 + $0x18] sm:$0xff] %vm815_vm6, %v1097_v7  ;;  %1204 = vmatpush.msrb.mxu0 %v1171_v8  ;;  %v1167_v22 = vld [vmem:[#allocation4 + $0x28] sm:$0xff] }
 0x73c   : > { %1157 = vst.msk [vmem:[#allocation4 + $0x88] sm:$0xff] %vm815_vm6, %v1153_v10 }
 0x73d   : > { %1205 = vmatpush.msrb.mxu0 %v1170_v11 }
 0x73f   : > { %1206 = vmatpush.msrb.mxu0 %v1169_v13 }
 0x741   : > { %1207 = vmatpush.msrb.mxu0 %v1168_v16 }
 0x742   : > { %v1151_v21 = vpop.permute.xlu0 %1150  ;;  %v1165_v25 = vld [vmem:[#allocation4 + $0x18] sm:$0xff] }
 0x743   : > { %1156 = vst.msk [vmem:[#allocation4 + $0x80] sm:$0xff] %vm815_vm6, %v1151_v21  ;;  %1208 = vmatpush.msrb.mxu0 %v1167_v22  ;;  %v1179_v23 = vld [vmem:[#allocation4 + $0x88] sm:$0xff] }
 0x744   : > { %1235 = vmatpush.msra.mxu2 %v1179_v23 }
 0x745   : > { %1209 = vmatpush.msrb.mxu0 %v1166_v24 }
 0x747   : > { %1210 = vmatpush.msrb.mxu0 %v1165_v25 }
 0x749   : > { %1211 = vmatpush.msrb.mxu0 %v1164_v26 }
 0x74a   : > { %v1178_v28 = vld [vmem:[#allocation4 + $0x80] sm:$0xff]  ;;  %v1321_v47 = vpop.permute.xlu0 %1320 }
 0x74b   : > { %1212 = vmatpush.msrb.mxu0 %v1163_v27  ;;  %1236 = vmatpush.msra.mxu2 %v1178_v28 }
 0x74c   : > { %1416 = vmatmul.msk.f32.vlgmr.msra.gmra.mxu2 %vm785_vm5, %v1755_v9 }
 0x74d   : > { %1213 = vmatpush.msrb.mxu0 %v1162_v29 }
 0x74e   : > { %1214 = vmatmul.f32.vlgmr.msrb.gmra.mxu0 %v1762_v12  ;;  %v1185_v12 = vpop.permute.xlu1 %1184 }
 0x754   : > { %1417 = vmatmul.msk.f32.gmra.mxu2 %vm785_vm5, %v1770_v14 }
 0x756   : > { %1217 = vmatmul.f32.gmra.mxu0 %v1777_v15  ;;  %v1326_v53 = vpop.permute.xlu1 %1325 }
 0x7cb   : > { %v1215_v9 = vpop.f32.mrf.mxu0 }
 0x7cc   : > { %v1216_v31 = vadd.f32 %v1215_v9, %v1185_v12 }
 0x7cf   : > { %v1238_v14 = vpop.f32.mrf.mxu2 }
 0x7d0   : > { %v1239_v32 = vadd.f32 %v1238_v14, %v1216_v31 }
 0x7d2   : > { %v1244_v15 = vmax.f32 %v1239_v32, 0.0 }
 0x7d3   : > { %v1218_v34 = vpop.f32.mrf.mxu0 }
 0x7d4   : > { %1419 = vmatmul.msk.f32.vlgmr.msra.gmra.mxu1 %vm815_vm6, %v1244_v15  ;;  %v1219_v37 = vadd.f32 %v1218_v34, %v1190_v36 }
 0x7d7   : > { %v1241_v43 = vpop.f32.mrf.mxu2 }
 0x7d8   : > { %v1242_v17 = vadd.f32 %v1241_v43, %v1219_v37 }
 0x7da   : > { %v1245_v44 = vmax.f32 %v1242_v17, 0.0 }
 0x7dc   : > { %1420 = vmatmul.msk.f32.gmra.mxu1 %vm815_vm6, %v1245_v44 }
 0x851   : > { %v1277_v18 = vpop.f32.mrf.mxu1 }
 0x859   : > { %v1280_v19 = vpop.f32.mrf.mxu1 }
 0x85a   : > { %1305 = vmatpush.msrb.mxu3 %v1280_v19 }
 0x85c   : > { %1306 = vmatpush.msrb.mxu3 %v1277_v18 }
 0x85d   : > { %1421 = vmatmul.msk.f32.vlgmr.msrb.gmra.mxu3 %vm785_vm5, %v1816_v38 }
 0x865   : > { %1422 = vmatmul.msk.f32.gmra.mxu3 %vm785_vm5, %v1823_v42 }
 0x8e0   : > { %v1308_v20 = vpop.f32.mrf.mxu3 }
 0x8e1   : > { %v1314_v45 = vadd.f32 %v1308_v20, %v1828_v46 }
 0x8e3   : > { %v1328_v48 = vadd.f32 %v1321_v47, %v1314_v45 }
 0x8e5   : > { %v1330_v49 = vmax.f32 %v1328_v48, 0.0 }
 0x8e7   : > { %v1332_v50 = vadd.f32 %v1330_v49, %v1692_v33 }
 0x8e8   : > { %v1311_v52 = vpop.f32.mrf.mxu3 }
 0x8e9   : > { %1334 = vst.msk [vmem:[%s494_s27] sm:$0xff] %vm785_vm5, %v1332_v50  ;;  %v1315_v38 = vadd.f32 %v1311_v52, %v1833_v51 }
 0x8eb   : > { %v1329_v42 = vadd.f32 %v1326_v53, %v1315_v38 }
 0x8ed   : > { %v1331_v54 = vmax.f32 %v1329_v42, 0.0 }
 0x8ef   : > { %v1333_v46 = vadd.f32 %v1331_v54, %v1696_v35 }
 0x8f1   : > { %1335 = vst.msk [vmem:[%s494_s27 + $0x8] sm:$0xff] %vm785_vm5, %v1333_v46 }
 0x8f2 PF: > { %s25_s18 = sadd.s32 1, %s1465_s18  }
 0x8f3   : > { %p22_p4 = scmp.ge.s32.totalorder %s25_s18, 4  }
 0x8f5   :  { %24 = sbr.rel (!%p22_p4) target bundleno = 1 (0x1), region = 110 }

</bundles_post_ra>
